<compile_context>
chip_gen: v7x
topology: tpu7x:2x2x1
jax: 0.10.0
libtpu: 0.0.40
codegen_flags: <defaults>
</compile_context>

<pallas_src>
import functools

import jax
import jax.numpy as jnp
from jax.experimental import pallas as pl
from jax.experimental.pallas import tpu as pltpu

CPAD = 128           # lane-dense channel padding
VMEM_LIMIT = 32 * 1024 * 1024


def _round_up(x, m):
    return (x + m - 1) // m * m


def _choose_tm(m, target=512):
    """Row-tile size: multiple of 8 (or full M) so BlockSpecs are legal."""
    if m <= target:
        return m
    for tm in (target, 256, 128, 64, 32, 16, 8):
        if m % tm == 0:
            return tm
    return target  # ragged tail handled by Pallas OOB masking


def _choose_images_per_tile(batch, down2, max_rows=1024):
    """Largest divisor of batch with rows <= max_rows and a legal block shape."""
    for d in range(batch, 0, -1):
        if batch % d:
            continue
        if d * down2 > max_rows:
            continue
        if d == batch or d % 8 == 0:
            return d
    return batch


# ---------------------------------------------------------------------------
# Pallas kernels
# ---------------------------------------------------------------------------
def _fused_conv_block_kernel(x_ref, w_ref, b_ref, scale_ref, shift_ref, o_ref):
    """out = BN(LeakyReLU(x @ w + b)); bf16 matmul, f32 epilogue, bf16 store."""
    acc = jnp.dot(x_ref[...], w_ref[...], preferred_element_type=jnp.float32)
    acc = acc + b_ref[...]
    acc = jnp.where(acc >= 0.0, acc, 0.2 * acc)          # LeakyReLU(0.2)
    acc = acc * scale_ref[...] + shift_ref[...]          # folded eval-mode BN
    o_ref[...] = acc.astype(o_ref.dtype)


def _fused_last_block_linear_kernel(x_ref, w_ref, b_ref, scale_ref, shift_ref,
                                    lw_ref, lb_ref, o_ref, *, ipt, down2):
    """Last conv block fused with the adversarial Linear (per-image scalar)."""
    acc = jnp.dot(x_ref[...], w_ref[...], preferred_element_type=jnp.float32)
    acc = acc + b_ref[...]
    acc = jnp.where(acc >= 0.0, acc, 0.2 * acc)
    acc = acc * scale_ref[...] + shift_ref[...]          # (rows, 128) f32
    if down2 == 1:                                       # rows == images
        z = acc * lw_ref[...]                            # (rows, 128)
        s = jnp.sum(z, axis=1, keepdims=True)            # (ipt, 1)
    else:
        n = acc.shape[-1]
        y = acc.reshape(ipt, down2, n) * lw_ref[...]     # broadcast (down2, n)
        s = jnp.sum(y, axis=2)                           # (ipt, down2)
        s = jnp.sum(s, axis=1, keepdims=True)            # (ipt, 1)
    o_ref[...] = (s + lb_ref[...]).astype(o_ref.dtype)


# ---------------------------------------------------------------------------
# pallas_call wrappers
# ---------------------------------------------------------------------------
def fused_conv_block(cols, w_mat, b, scale, shift):
    """cols: (M, K) bf16, w_mat: (K, 128) bf16, b/scale/shift: (1, 128) f32."""
    M, K = cols.shape
    _, N = w_mat.shape
    tm = _choose_tm(M)
    return pl.pallas_call(
        _fused_conv_block_kernel,
        out_shape=jax.ShapeDtypeStruct((M, N), jnp.bfloat16),
        grid=(pl.cdiv(M, tm),),
        in_specs=[
            pl.BlockSpec((tm, K), lambda i: (i, 0)),
            pl.BlockSpec((K, N), lambda i: (0, 0)),   # resident weights
            pl.BlockSpec((1, N), lambda i: (0, 0)),
            pl.BlockSpec((1, N), lambda i: (0, 0)),
            pl.BlockSpec((1, N), lambda i: (0, 0)),
        ],
        out_specs=pl.BlockSpec((tm, N), lambda i: (i, 0)),
        compiler_params=pltpu.CompilerParams(
            dimension_semantics=("parallel",),
            vmem_limit_bytes=VMEM_LIMIT),
    )(cols, w_mat, b, scale, shift)


def fused_last_block_linear(cols, w_mat, b, scale, shift, lw, lb, batch, down2):
    """Last conv block + Linear. cols: (batch*down2, K); output: (batch, 1)."""
    M, K = cols.shape
    _, N = w_mat.shape
    ipt = _choose_images_per_tile(batch, down2)
    rows = ipt * down2
    kernel = functools.partial(_fused_last_block_linear_kernel,
                               ipt=ipt, down2=down2)
    return pl.pallas_call(
        kernel,
        out_shape=jax.ShapeDtypeStruct((batch, 1), jnp.float32),
        grid=(batch // ipt,),
        in_specs=[
            pl.BlockSpec((rows, K), lambda i: (i, 0)),
            pl.BlockSpec((K, N), lambda i: (0, 0)),
            pl.BlockSpec((1, N), lambda i: (0, 0)),
            pl.BlockSpec((1, N), lambda i: (0, 0)),
            pl.BlockSpec((1, N), lambda i: (0, 0)),
            pl.BlockSpec((down2, N), lambda i: (0, 0)),
            pl.BlockSpec((1, 1), lambda i: (0, 0)),
        ],
        out_specs=pl.BlockSpec((ipt, 1), lambda i: (i, 0)),
        compiler_params=pltpu.CompilerParams(
            dimension_semantics=("parallel",),
            vmem_limit_bytes=VMEM_LIMIT),
    )(cols, w_mat, b, scale, shift, lw, lb)


# ---------------------------------------------------------------------------
# Glue: im2col for Conv2d(k=3, stride=2, pad=1), NHWC layout, (ky,kx,c) order
# ---------------------------------------------------------------------------
def im2col_3x3_s2_p1(x_nhwc):
    n, h, w, c = x_nhwc.shape
    ho = (h + 2 - 3) // 2 + 1
    wo = (w + 2 - 3) // 2 + 1
    xp = jnp.pad(x_nhwc, ((0, 0), (1, 1), (1, 1), (0, 0)))
    patches = []
    for ky in range(3):
        for kx in range(3):
            patches.append(xp[:, ky::2, kx::2, :][:, :ho, :wo, :])
    cols = jnp.stack(patches, axis=3)                 # (N, Ho, Wo, 9, C)
    cols = cols.reshape(n * ho * wo, 9 * c)
    return cols, (n, ho, wo)


# ---------------------------------------------------------------------------
# Parameters (PyTorch-shaped raw params + hoisted kernel-ready padded params)
# ---------------------------------------------------------------------------
def make_params(key, img_size, input_channels):
    eps = 0.8  # nn.BatchNorm2d(out_filters, 0.8) -> eps=0.8
    plan = [(input_channels, 16, False), (16, 32, True),
            (32, 64, True), (64, 128, True)]
    blocks = []
    for (cin, cout, has_bn) in plan:
        key, kw, kb, kg, kbeta, km, kv = jax.random.split(key, 7)
        w = jax.random.normal(kw, (cout, cin, 3, 3), jnp.float32) * 0.05
        b = jax.random.normal(kb, (cout,), jnp.float32) * 0.05
        if has_bn:
            gamma = 1.0 + 0.1 * jax.random.normal(kg, (cout,), jnp.float32)
            beta = 0.1 * jax.random.normal(kbeta, (cout,), jnp.float32)
            rm = 0.1 * jax.random.normal(km, (cout,), jnp.float32)
            rv = 1.0 + 0.1 * jax.random.uniform(kv, (cout,), jnp.float32)
        else:
            gamma = beta = rm = rv = None
        blocks.append(dict(w=w, b=b, gamma=gamma, beta=beta, rm=rm, rv=rv,
                           has_bn=has_bn, cin=cin, cout=cout))

    down = img_size // (2 ** 4)
    feat = 128 * down * down
    key, kw2, kb2 = jax.random.split(key, 3)
    lin_w = jax.random.normal(kw2, (1, feat), jnp.float32) * 0.05  # (out, in)
    lin_b = jax.random.normal(kb2, (1,), jnp.float32) * 0.05
    return dict(blocks=blocks, lin_w=lin_w, lin_b=lin_b, eps=eps, down=down)


def prepare_kernel_params(params):
    """Hoisted weight prep: fold BN, pad channels/K to 128, reshape Linear."""
    eps = params["eps"]
    kblocks = []
    for idx, blk in enumerate(params["blocks"]):
        w, b = blk["w"], blk["b"]
        cout, cin = blk["cout"], blk["cin"]
        if blk["has_bn"]:
            scale_r = blk["gamma"] / jnp.sqrt(blk["rv"] + eps)
            shift_r = blk["beta"] - blk["rm"] * scale_r
        else:
            scale_r = jnp.ones((cout,), jnp.float32)
            shift_r = jnp.zeros((cout,), jnp.float32)

        if idx == 0:
            # input channels not padded: flatten (ky,kx,cin) then pad K to 128
            w_t = jnp.transpose(w, (2, 3, 1, 0)).reshape(9 * cin, cout)
            k_pad = _round_up(9 * cin, 128)
            w_mat = jnp.zeros((k_pad, CPAD), jnp.float32)
            w_mat = w_mat.at[:9 * cin, :cout].set(w_t)
        else:
            # input channels carried padded to CPAD: pad per-channel then flatten
            w_t = jnp.transpose(w, (2, 3, 1, 0))              # (3,3,cin,cout)
            w_pad = jnp.zeros((3, 3, CPAD, CPAD), jnp.float32)
            w_pad = w_pad.at[:, :, :cin, :cout].set(w_t)
            w_mat = w_pad.reshape(9 * CPAD, CPAD)

        b_pad = jnp.zeros((1, CPAD), jnp.float32).at[0, :cout].set(b)
        scale_pad = jnp.ones((1, CPAD), jnp.float32).at[0, :cout].set(scale_r)
        shift_pad = jnp.zeros((1, CPAD), jnp.float32).at[0, :cout].set(shift_r)
        kblocks.append(dict(w_mat=w_mat.astype(jnp.bfloat16), b=b_pad,
                            scale=scale_pad, shift=shift_pad))

    # Linear weight: PyTorch order is (c, h, w); re-order to NHWC row order
    down = params["down"]
    down2 = down * down
    lw = params["lin_w"].reshape(128, down, down)
    lw = jnp.transpose(lw, (1, 2, 0)).reshape(down2, 128)     # (h*w, c)
    lb = params["lin_b"].reshape(1, 1)
    return dict(blocks=kblocks, lw=lw, lb=lb)


# ---------------------------------------------------------------------------
# Forward pass (Pallas) and pure-JAX reference
# ---------------------------------------------------------------------------
@jax.jit
def discriminator_forward(img_nchw, kparams):
    x = jnp.transpose(img_nchw, (0, 2, 3, 1)).astype(jnp.bfloat16)   # NHWC bf16
    blocks = kparams["blocks"]
    for blk in blocks[:-1]:
        cols, (n, ho, wo) = im2col_3x3_s2_p1(x)
        k_w = blk["w_mat"].shape[0]
        if cols.shape[1] < k_w:
            cols = jnp.pad(cols, ((0, 0), (0, k_w - cols.shape[1])))
        y = fused_conv_block(cols, blk["w_mat"], blk["b"],
                             blk["scale"], blk["shift"])
        x = y.reshape(n, ho, wo, y.shape[-1])
    blk = blocks[-1]
    cols, (n, ho, wo) = im2col_3x3_s2_p1(x)
    return fused_last_block_linear(cols, blk["w_mat"], blk["b"], blk["scale"],
                                   blk["shift"], kparams["lw"], kparams["lb"],
                                   batch=n, down2=ho * wo)


def reference_forward(img_nchw, params):
    """Pure-JAX reference with matching bf16 matmul / bf16 activation storage."""
    eps = params["eps"]
    x = img_nchw.astype(jnp.float32)
    nb = len(params["blocks"])
    for i, blk in enumerate(params["blocks"]):
        y = jax.lax.conv_general_dilated(
            x.astype(jnp.bfloat16), blk["w"].astype(jnp.bfloat16),
            window_strides=(2, 2), padding=((1, 1), (1, 1)),
            dimension_numbers=("NCHW", "OIHW", "NCHW"),
            preferred_element_type=jnp.float32)
        y = y + blk["b"][None, :, None, None]
        y = jnp.where(y >= 0.0, y, 0.2 * y)
        if blk["has_bn"]:
            scale = blk["gamma"] / jnp.sqrt(blk["rv"] + eps)
            shift = blk["beta"] - blk["rm"] * scale
            y = y * scale[None, :, None, None] + shift[None, :, None, None]
        if i < nb - 1:
            y = y.astype(jnp.bfloat16).astype(jnp.float32)
        x = y
    feats = x.reshape(x.shape[0], -1)                      # NCHW flatten
    return feats @ params["lin_w"].T + params["lin_b"][None, :]


# ---------------------------------------------------------------------------
if __name__ == "__main__":
    IMG_SIZE = 16
    IN_CHANNELS = 4
    BATCH = 2

    key = jax.random.PRNGKey(0)
    key, kimg = jax.random.split(key)
    img = jax.random.normal(kimg, (BATCH, IN_CHANNELS, IMG_SIZE, IMG_SIZE),
                            jnp.float32)
    params = make_params(key, IMG_SIZE, IN_CHANNELS)
    kparams = prepare_kernel_params(params)

    out = discriminator_forward(img, kparams)
    out = jax.block_until_ready(out)
    assert out.shape == (BATCH, 1), out.shape
    assert bool(jnp.all(jnp.isfinite(out)))

    ref = reference_forward(img, params)
    err = float(jnp.max(jnp.abs(out - ref)))
    assert err < 2e-3, f"mismatch vs reference: max abs err {err}"
    print("KERNEL_OK")
</pallas_src>

<mosaic_0001>
module attributes {stable_mosaic.version = 11 : i64} {
  func.func @_fused_conv_block_kernel(%arg0: i32, %arg1: memref<128x128xbf16, #tpu.memory_space<vmem>>, %arg2: memref<128x128xbf16, #tpu.memory_space<vmem>>, %arg3: memref<1x128xf32, #tpu.memory_space<vmem>>, %arg4: memref<1x128xf32, #tpu.memory_space<vmem>>, %arg5: memref<1x128xf32, #tpu.memory_space<vmem>>, %arg6: memref<128x128xbf16, #tpu.memory_space<vmem>>) attributes {dimension_semantics = [#tpu.dimension_semantics<parallel>], iteration_bounds = array<i64: 1>, scalar_prefetch = 0 : i64, scratch_operands = 0 : i64, tpu.core_type = #tpu.core_type<tc>, window_params = [{transform_indices = @transform_0, window_bounds = array<i64: 128, 128>}, {pipeline_mode = #tpu.pipeline_mode<synchronous>, transform_indices = @transform_1, window_bounds = array<i64: 128, 128>}, {pipeline_mode = #tpu.pipeline_mode<synchronous>, transform_indices = @transform_2, window_bounds = array<i64: 1, 128>}, {pipeline_mode = #tpu.pipeline_mode<synchronous>, transform_indices = @transform_3, window_bounds = array<i64: 1, 128>}, {pipeline_mode = #tpu.pipeline_mode<synchronous>, transform_indices = @transform_4, window_bounds = array<i64: 1, 128>}, {transform_indices = @transform_5, window_bounds = array<i64: 128, 128>}]} {
    %c0 = arith.constant 0 : index
    %c0_0 = arith.constant 0 : index
    %0 = vector.load %arg1[%c0, %c0_0] : memref<128x128xbf16, #tpu.memory_space<vmem>>, vector<128x128xbf16>
    %c0_1 = arith.constant 0 : index
    %c0_2 = arith.constant 0 : index
    %1 = vector.load %arg2[%c0_1, %c0_2] : memref<128x128xbf16, #tpu.memory_space<vmem>>, vector<128x128xbf16>
    %cst = arith.constant dense<0.000000e+00> : vector<128x128xf32>
    %2 = tpu.matmul %0, %1, %cst {dimension_numbers = #tpu.dot_dimension_numbers<[1], [0], [0], [1], [0, 0, 1, 1], [], []>} : vector<128x128xbf16>, vector<128x128xbf16>, vector<128x128xf32> -> vector<128x128xf32>
    %c0_3 = arith.constant 0 : index
    %c0_4 = arith.constant 0 : index
    %3 = vector.load %arg3[%c0_3, %c0_4] : memref<1x128xf32, #tpu.memory_space<vmem>>, vector<1x128xf32>
    %4 = vector.broadcast %3 : vector<1x128xf32> to vector<128x128xf32>
    %5 = arith.addf %2, %4 : vector<128x128xf32>
    %cst_5 = arith.constant 0.000000e+00 : f32
    %6 = vector.broadcast %cst_5 : f32 to vector<128x128xf32>
    %7 = arith.cmpf oge, %5, %6 : vector<128x128xf32>
    %cst_6 = arith.constant 2.000000e-01 : f32
    %8 = vector.broadcast %cst_6 : f32 to vector<128x128xf32>
    %9 = arith.mulf %8, %5 : vector<128x128xf32>
    %10 = arith.select %7, %5, %9 : vector<128x128xi1>, vector<128x128xf32>
    %c0_7 = arith.constant 0 : index
    %c0_8 = arith.constant 0 : index
    %11 = vector.load %arg4[%c0_7, %c0_8] : memref<1x128xf32, #tpu.memory_space<vmem>>, vector<1x128xf32>
    %12 = vector.broadcast %11 : vector<1x128xf32> to vector<128x128xf32>
    %13 = arith.mulf %10, %12 : vector<128x128xf32>
    %c0_9 = arith.constant 0 : index
    %c0_10 = arith.constant 0 : index
    %14 = vector.load %arg5[%c0_9, %c0_10] : memref<1x128xf32, #tpu.memory_space<vmem>>, vector<1x128xf32>
    %15 = vector.broadcast %14 : vector<1x128xf32> to vector<128x128xf32>
    %16 = arith.addf %13, %15 : vector<128x128xf32>
    %17 = arith.truncf %16 : vector<128x128xf32> to vector<128x128xbf16>
    %c0_11 = arith.constant 0 : index
    %c0_12 = arith.constant 0 : index
    %18 = vector.load %arg6[%c0_11, %c0_12] : memref<128x128xbf16, #tpu.memory_space<vmem>>, vector<128x128xbf16>
    tpu.vector_store %arg6[%c0_11, %c0_12], %17 {strides = array<i32>} : memref<128x128xbf16, #tpu.memory_space<vmem>>, vector<128x128xbf16>,
    return
  }
  func.func @transform_0(%arg0: i32) -> (i32, i32) {
    %c0_i32 = arith.constant 0 : i32
    %c0_i32_0 = arith.constant 0 : i32
    return %arg0, %c0_i32 : i32, i32
  }
  func.func @transform_1(%arg0: i32) -> (i32, i32) {
    %c0_i32 = arith.constant 0 : i32
    %c0_i32_0 = arith.constant 0 : i32
    %c0_i32_1 = arith.constant 0 : i32
    return %c0_i32, %c0_i32_0 : i32, i32
  }
  func.func @transform_2(%arg0: i32) -> (i32, i32) {
    %c0_i32 = arith.constant 0 : i32
    %c0_i32_0 = arith.constant 0 : i32
    %c0_i32_1 = arith.constant 0 : i32
    return %c0_i32, %c0_i32_0 : i32, i32
  }
  func.func @transform_3(%arg0: i32) -> (i32, i32) {
    %c0_i32 = arith.constant 0 : i32
    %c0_i32_0 = arith.constant 0 : i32
    %c0_i32_1 = arith.constant 0 : i32
    return %c0_i32, %c0_i32_0 : i32, i32
  }
  func.func @transform_4(%arg0: i32) -> (i32, i32) {
    %c0_i32 = arith.constant 0 : i32
    %c0_i32_0 = arith.constant 0 : i32
    %c0_i32_1 = arith.constant 0 : i32
    return %c0_i32, %c0_i32_0 : i32, i32
  }
  func.func @transform_5(%arg0: i32) -> (i32, i32) {
    %c0_i32 = arith.constant 0 : i32
    %c0_i32_0 = arith.constant 0 : i32
    return %arg0, %c0_i32 : i32, i32
  }
}

module attributes {stable_mosaic.version = 11 : i64} {
  func.func @_fused_conv_block_kernel(%arg0: i32, %arg1: memref<32x1152xbf16, #tpu.memory_space<vmem>>, %arg2: memref<1152x128xbf16, #tpu.memory_space<vmem>>, %arg3: memref<1x128xf32, #tpu.memory_space<vmem>>, %arg4: memref<1x128xf32, #tpu.memory_space<vmem>>, %arg5: memref<1x128xf32, #tpu.memory_space<vmem>>, %arg6: memref<32x128xbf16, #tpu.memory_space<vmem>>) attributes {dimension_semantics = [#tpu.dimension_semantics<parallel>], iteration_bounds = array<i64: 1>, scalar_prefetch = 0 : i64, scratch_operands = 0 : i64, tpu.core_type = #tpu.core_type<tc>, window_params = [{transform_indices = @transform_0, window_bounds = array<i64: 32, 1152>}, {pipeline_mode = #tpu.pipeline_mode<synchronous>, transform_indices = @transform_1, window_bounds = array<i64: 1152, 128>}, {pipeline_mode = #tpu.pipeline_mode<synchronous>, transform_indices = @transform_2, window_bounds = array<i64: 1, 128>}, {pipeline_mode = #tpu.pipeline_mode<synchronous>, transform_indices = @transform_3, window_bounds = array<i64: 1, 128>}, {pipeline_mode = #tpu.pipeline_mode<synchronous>, transform_indices = @transform_4, window_bounds = array<i64: 1, 128>}, {transform_indices = @transform_5, window_bounds = array<i64: 32, 128>}]} {
    %c0 = arith.constant 0 : index
    %c0_0 = arith.constant 0 : index
    %0 = vector.load %arg1[%c0, %c0_0] : memref<32x1152xbf16, #tpu.memory_space<vmem>>, vector<32x1152xbf16>
    %c0_1 = arith.constant 0 : index
    %c0_2 = arith.constant 0 : index
    %1 = vector.load %arg2[%c0_1, %c0_2] : memref<1152x128xbf16, #tpu.memory_space<vmem>>, vector<1152x128xbf16>
    %cst = arith.constant dense<0.000000e+00> : vector<32x128xf32>
    %2 = tpu.matmul %0, %1, %cst {dimension_numbers = #tpu.dot_dimension_numbers<[1], [0], [0], [1], [0, 0, 1, 1], [], []>} : vector<32x1152xbf16>, vector<1152x128xbf16>, vector<32x128xf32> -> vector<32x128xf32>
    %c0_3 = arith.constant 0 : index
    %c0_4 = arith.constant 0 : index
    %3 = vector.load %arg3[%c0_3, %c0_4] : memref<1x128xf32, #tpu.memory_space<vmem>>, vector<1x128xf32>
    %4 = vector.broadcast %3 : vector<1x128xf32> to vector<32x128xf32>
    %5 = arith.addf %2, %4 : vector<32x128xf32>
    %cst_5 = arith.constant 0.000000e+00 : f32
    %6 = vector.broadcast %cst_5 : f32 to vector<32x128xf32>
    %7 = arith.cmpf oge, %5, %6 : vector<32x128xf32>
    %cst_6 = arith.constant 2.000000e-01 : f32
    %8 = vector.broadcast %cst_6 : f32 to vector<32x128xf32>
    %9 = arith.mulf %8, %5 : vector<32x128xf32>
    %10 = arith.select %7, %5, %9 : vector<32x128xi1>, vector<32x128xf32>
    %c0_7 = arith.constant 0 : index
    %c0_8 = arith.constant 0 : index
    %11 = vector.load %arg4[%c0_7, %c0_8] : memref<1x128xf32, #tpu.memory_space<vmem>>, vector<1x128xf32>
    %12 = vector.broadcast %11 : vector<1x128xf32> to vector<32x128xf32>
    %13 = arith.mulf %10, %12 : vector<32x128xf32>
    %c0_9 = arith.constant 0 : index
    %c0_10 = arith.constant 0 : index
    %14 = vector.load %arg5[%c0_9, %c0_10] : memref<1x128xf32, #tpu.memory_space<vmem>>, vector<1x128xf32>
    %15 = vector.broadcast %14 : vector<1x128xf32> to vector<32x128xf32>
    %16 = arith.addf %13, %15 : vector<32x128xf32>
    %17 = arith.truncf %16 : vector<32x128xf32> to vector<32x128xbf16>
    %c0_11 = arith.constant 0 : index
    %c0_12 = arith.constant 0 : index
    %18 = vector.load %arg6[%c0_11, %c0_12] : memref<32x128xbf16, #tpu.memory_space<vmem>>, vector<32x128xbf16>
    tpu.vector_store %arg6[%c0_11, %c0_12], %17 {strides = array<i32>} : memref<32x128xbf16, #tpu.memory_space<vmem>>, vector<32x128xbf16>,
    return
  }
  func.func @transform_0(%arg0: i32) -> (i32, i32) {
    %c0_i32 = arith.constant 0 : i32
    %c0_i32_0 = arith.constant 0 : i32
    return %arg0, %c0_i32 : i32, i32
  }
  func.func @transform_1(%arg0: i32) -> (i32, i32) {
    %c0_i32 = arith.constant 0 : i32
    %c0_i32_0 = arith.constant 0 : i32
    %c0_i32_1 = arith.constant 0 : i32
    return %c0_i32, %c0_i32_0 : i32, i32
  }
  func.func @transform_2(%arg0: i32) -> (i32, i32) {
    %c0_i32 = arith.constant 0 : i32
    %c0_i32_0 = arith.constant 0 : i32
    %c0_i32_1 = arith.constant 0 : i32
    return %c0_i32, %c0_i32_0 : i32, i32
  }
  func.func @transform_3(%arg0: i32) -> (i32, i32) {
    %c0_i32 = arith.constant 0 : i32
    %c0_i32_0 = arith.constant 0 : i32
    %c0_i32_1 = arith.constant 0 : i32
    return %c0_i32, %c0_i32_0 : i32, i32
  }
  func.func @transform_4(%arg0: i32) -> (i32, i32) {
    %c0_i32 = arith.constant 0 : i32
    %c0_i32_0 = arith.constant 0 : i32
    %c0_i32_1 = arith.constant 0 : i32
    return %c0_i32, %c0_i32_0 : i32, i32
  }
  func.func @transform_5(%arg0: i32) -> (i32, i32) {
    %c0_i32 = arith.constant 0 : i32
    %c0_i32_0 = arith.constant 0 : i32
    return %arg0, %c0_i32 : i32, i32
  }
}

module attributes {stable_mosaic.version = 11 : i64} {
  func.func @_fused_conv_block_kernel(%arg0: i32, %arg1: memref<8x1152xbf16, #tpu.memory_space<vmem>>, %arg2: memref<1152x128xbf16, #tpu.memory_space<vmem>>, %arg3: memref<1x128xf32, #tpu.memory_space<vmem>>, %arg4: memref<1x128xf32, #tpu.memory_space<vmem>>, %arg5: memref<1x128xf32, #tpu.memory_space<vmem>>, %arg6: memref<8x128xbf16, #tpu.memory_space<vmem>>) attributes {dimension_semantics = [#tpu.dimension_semantics<parallel>], iteration_bounds = array<i64: 1>, scalar_prefetch = 0 : i64, scratch_operands = 0 : i64, tpu.core_type = #tpu.core_type<tc>, window_params = [{transform_indices = @transform_0, window_bounds = array<i64: 8, 1152>}, {pipeline_mode = #tpu.pipeline_mode<synchronous>, transform_indices = @transform_1, window_bounds = array<i64: 1152, 128>}, {pipeline_mode = #tpu.pipeline_mode<synchronous>, transform_indices = @transform_2, window_bounds = array<i64: 1, 128>}, {pipeline_mode = #tpu.pipeline_mode<synchronous>, transform_indices = @transform_3, window_bounds = array<i64: 1, 128>}, {pipeline_mode = #tpu.pipeline_mode<synchronous>, transform_indices = @transform_4, window_bounds = array<i64: 1, 128>}, {transform_indices = @transform_5, window_bounds = array<i64: 8, 128>}]} {
    %c0 = arith.constant 0 : index
    %c0_0 = arith.constant 0 : index
    %0 = vector.load %arg1[%c0, %c0_0] : memref<8x1152xbf16, #tpu.memory_space<vmem>>, vector<8x1152xbf16>
    %c0_1 = arith.constant 0 : index
    %c0_2 = arith.constant 0 : index
    %1 = vector.load %arg2[%c0_1, %c0_2] : memref<1152x128xbf16, #tpu.memory_space<vmem>>, vector<1152x128xbf16>
    %cst = arith.constant dense<0.000000e+00> : vector<8x128xf32>
    %2 = tpu.matmul %0, %1, %cst {dimension_numbers = #tpu.dot_dimension_numbers<[1], [0], [0], [1], [0, 0, 1, 1], [], []>} : vector<8x1152xbf16>, vector<1152x128xbf16>, vector<8x128xf32> -> vector<8x128xf32>
    %c0_3 = arith.constant 0 : index
    %c0_4 = arith.constant 0 : index
    %3 = vector.load %arg3[%c0_3, %c0_4] : memref<1x128xf32, #tpu.memory_space<vmem>>, vector<1x128xf32>
    %4 = vector.broadcast %3 : vector<1x128xf32> to vector<8x128xf32>
    %5 = arith.addf %2, %4 : vector<8x128xf32>
    %cst_5 = arith.constant 0.000000e+00 : f32
    %6 = vector.broadcast %cst_5 : f32 to vector<8x128xf32>
    %7 = arith.cmpf oge, %5, %6 : vector<8x128xf32>
    %cst_6 = arith.constant 2.000000e-01 : f32
    %8 = vector.broadcast %cst_6 : f32 to vector<8x128xf32>
    %9 = arith.mulf %8, %5 : vector<8x128xf32>
    %10 = arith.select %7, %5, %9 : vector<8x128xi1>, vector<8x128xf32>
    %c0_7 = arith.constant 0 : index
    %c0_8 = arith.constant 0 : index
    %11 = vector.load %arg4[%c0_7, %c0_8] : memref<1x128xf32, #tpu.memory_space<vmem>>, vector<1x128xf32>
    %12 = vector.broadcast %11 : vector<1x128xf32> to vector<8x128xf32>
    %13 = arith.mulf %10, %12 : vector<8x128xf32>
    %c0_9 = arith.constant 0 : index
    %c0_10 = arith.constant 0 : index
    %14 = vector.load %arg5[%c0_9, %c0_10] : memref<1x128xf32, #tpu.memory_space<vmem>>, vector<1x128xf32>
    %15 = vector.broadcast %14 : vector<1x128xf32> to vector<8x128xf32>
    %16 = arith.addf %13, %15 : vector<8x128xf32>
    %17 = arith.truncf %16 : vector<8x128xf32> to vector<8x128xbf16>
    %c0_11 = arith.constant 0 : index
    %c0_12 = arith.constant 0 : index
    %18 = vector.load %arg6[%c0_11, %c0_12] : memref<8x128xbf16, #tpu.memory_space<vmem>>, vector<8x128xbf16>
    tpu.vector_store %arg6[%c0_11, %c0_12], %17 {strides = array<i32>} : memref<8x128xbf16, #tpu.memory_space<vmem>>, vector<8x128xbf16>,
    return
  }
  func.func @transform_0(%arg0: i32) -> (i32, i32) {
    %c0_i32 = arith.constant 0 : i32
    %c0_i32_0 = arith.constant 0 : i32
    return %arg0, %c0_i32 : i32, i32
  }
  func.func @transform_1(%arg0: i32) -> (i32, i32) {
    %c0_i32 = arith.constant 0 : i32
    %c0_i32_0 = arith.constant 0 : i32
    %c0_i32_1 = arith.constant 0 : i32
    return %c0_i32, %c0_i32_0 : i32, i32
  }
  func.func @transform_2(%arg0: i32) -> (i32, i32) {
    %c0_i32 = arith.constant 0 : i32
    %c0_i32_0 = arith.constant 0 : i32
    %c0_i32_1 = arith.constant 0 : i32
    return %c0_i32, %c0_i32_0 : i32, i32
  }
  func.func @transform_3(%arg0: i32) -> (i32, i32) {
    %c0_i32 = arith.constant 0 : i32
    %c0_i32_0 = arith.constant 0 : i32
    %c0_i32_1 = arith.constant 0 : i32
    return %c0_i32, %c0_i32_0 : i32, i32
  }
  func.func @transform_4(%arg0: i32) -> (i32, i32) {
    %c0_i32 = arith.constant 0 : i32
    %c0_i32_0 = arith.constant 0 : i32
    %c0_i32_1 = arith.constant 0 : i32
    return %c0_i32, %c0_i32_0 : i32, i32
  }
  func.func @transform_5(%arg0: i32) -> (i32, i32) {
    %c0_i32 = arith.constant 0 : i32
    %c0_i32_0 = arith.constant 0 : i32
    return %arg0, %c0_i32 : i32, i32
  }
}

module attributes {stable_mosaic.version = 11 : i64} {
  func.func @_fused_last_block_linear_kernel(%arg0: i32, %arg1: memref<2x1152xbf16, #tpu.memory_space<vmem>>, %arg2: memref<1152x128xbf16, #tpu.memory_space<vmem>>, %arg3: memref<1x128xf32, #tpu.memory_space<vmem>>, %arg4: memref<1x128xf32, #tpu.memory_space<vmem>>, %arg5: memref<1x128xf32, #tpu.memory_space<vmem>>, %arg6: memref<1x128xf32, #tpu.memory_space<vmem>>, %arg7: memref<1x1xf32, #tpu.memory_space<vmem>>, %arg8: memref<2x1xf32, #tpu.memory_space<vmem>>) attributes {dimension_semantics = [#tpu.dimension_semantics<parallel>], iteration_bounds = array<i64: 1>, scalar_prefetch = 0 : i64, scratch_operands = 0 : i64, tpu.core_type = #tpu.core_type<tc>, window_params = [{transform_indices = @transform_0, window_bounds = array<i64: 2, 1152>}, {pipeline_mode = #tpu.pipeline_mode<synchronous>, transform_indices = @transform_1, window_bounds = array<i64: 1152, 128>}, {pipeline_mode = #tpu.pipeline_mode<synchronous>, transform_indices = @transform_2, window_bounds = array<i64: 1, 128>}, {pipeline_mode = #tpu.pipeline_mode<synchronous>, transform_indices = @transform_3, window_bounds = array<i64: 1, 128>}, {pipeline_mode = #tpu.pipeline_mode<synchronous>, transform_indices = @transform_4, window_bounds = array<i64: 1, 128>}, {pipeline_mode = #tpu.pipeline_mode<synchronous>, transform_indices = @transform_5, window_bounds = array<i64: 1, 128>}, {pipeline_mode = #tpu.pipeline_mode<synchronous>, transform_indices = @transform_6, window_bounds = array<i64: 1, 1>}, {transform_indices = @transform_7, window_bounds = array<i64: 2, 1>}]} {
    %c0 = arith.constant 0 : index
    %c0_0 = arith.constant 0 : index
    %0 = vector.load %arg1[%c0, %c0_0] : memref<2x1152xbf16, #tpu.memory_space<vmem>>, vector<2x1152xbf16>
    %c0_1 = arith.constant 0 : index
    %c0_2 = arith.constant 0 : index
    %1 = vector.load %arg2[%c0_1, %c0_2] : memref<1152x128xbf16, #tpu.memory_space<vmem>>, vector<1152x128xbf16>
    %cst = arith.constant dense<0.000000e+00> : vector<2x128xf32>
    %2 = tpu.matmul %0, %1, %cst {dimension_numbers = #tpu.dot_dimension_numbers<[1], [0], [0], [1], [0, 0, 1, 1], [], []>} : vector<2x1152xbf16>, vector<1152x128xbf16>, vector<2x128xf32> -> vector<2x128xf32>
    %c0_3 = arith.constant 0 : index
    %c0_4 = arith.constant 0 : index
    %3 = vector.load %arg3[%c0_3, %c0_4] : memref<1x128xf32, #tpu.memory_space<vmem>>, vector<1x128xf32>
    %4 = vector.broadcast %3 : vector<1x128xf32> to vector<2x128xf32>
    %5 = arith.addf %2, %4 : vector<2x128xf32>
    %cst_5 = arith.constant 0.000000e+00 : f32
    %6 = vector.broadcast %cst_5 : f32 to vector<2x128xf32>
    %7 = arith.cmpf oge, %5, %6 : vector<2x128xf32>
    %cst_6 = arith.constant 2.000000e-01 : f32
    %8 = vector.broadcast %cst_6 : f32 to vector<2x128xf32>
    %9 = arith.mulf %8, %5 : vector<2x128xf32>
    %10 = arith.select %7, %5, %9 : vector<2x128xi1>, vector<2x128xf32>
    %c0_7 = arith.constant 0 : index
    %c0_8 = arith.constant 0 : index
    %11 = vector.load %arg4[%c0_7, %c0_8] : memref<1x128xf32, #tpu.memory_space<vmem>>, vector<1x128xf32>
    %12 = vector.broadcast %11 : vector<1x128xf32> to vector<2x128xf32>
    %13 = arith.mulf %10, %12 : vector<2x128xf32>
    %c0_9 = arith.constant 0 : index
    %c0_10 = arith.constant 0 : index
    %14 = vector.load %arg5[%c0_9, %c0_10] : memref<1x128xf32, #tpu.memory_space<vmem>>, vector<1x128xf32>
    %15 = vector.broadcast %14 : vector<1x128xf32> to vector<2x128xf32>
    %16 = arith.addf %13, %15 : vector<2x128xf32>
    %c0_11 = arith.constant 0 : index
    %c0_12 = arith.constant 0 : index
    %17 = vector.load %arg6[%c0_11, %c0_12] : memref<1x128xf32, #tpu.memory_space<vmem>>, vector<1x128xf32>
    %18 = vector.broadcast %17 : vector<1x128xf32> to vector<2x128xf32>
    %19 = arith.mulf %16, %18 : vector<2x128xf32>
    %cst_13 = arith.constant dense<0.000000e+00> : vector<2xf32>
    %20 = vector.multi_reduction <add>, %19, %cst_13 [1] : vector<2x128xf32> to vector<2xf32>
    %21 = vector.shape_cast %20 : vector<2xf32> to vector<2x1xf32>
    %c0_14 = arith.constant 0 : index
    %c0_15 = arith.constant 0 : index
    %22 = vector.load %arg7[%c0_14, %c0_15] : memref<1x1xf32, #tpu.memory_space<vmem>>, vector<1x1xf32>
    %23 = vector.broadcast %22 : vector<1x1xf32> to vector<2x1xf32>
    %24 = arith.addf %21, %23 : vector<2x1xf32>
    %c0_16 = arith.constant 0 : index
    %c0_17 = arith.constant 0 : index
    %25 = vector.load %arg8[%c0_16, %c0_17] : memref<2x1xf32, #tpu.memory_space<vmem>>, vector<2x1xf32>
    tpu.vector_store %arg8[%c0_16, %c0_17], %24 {strides = array<i32>} : memref<2x1xf32, #tpu.memory_space<vmem>>, vector<2x1xf32>,
    return
  }
  func.func @transform_0(%arg0: i32) -> (i32, i32) {
    %c0_i32 = arith.constant 0 : i32
    %c0_i32_0 = arith.constant 0 : i32
    return %arg0, %c0_i32 : i32, i32
  }
  func.func @transform_1(%arg0: i32) -> (i32, i32) {
    %c0_i32 = arith.constant 0 : i32
    %c0_i32_0 = arith.constant 0 : i32
    %c0_i32_1 = arith.constant 0 : i32
    return %c0_i32, %c0_i32_0 : i32, i32
  }
  func.func @transform_2(%arg0: i32) -> (i32, i32) {
    %c0_i32 = arith.constant 0 : i32
    %c0_i32_0 = arith.constant 0 : i32
    %c0_i32_1 = arith.constant 0 : i32
    return %c0_i32, %c0_i32_0 : i32, i32
  }
  func.func @transform_3(%arg0: i32) -> (i32, i32) {
    %c0_i32 = arith.constant 0 : i32
    %c0_i32_0 = arith.constant 0 : i32
    %c0_i32_1 = arith.constant 0 : i32
    return %c0_i32, %c0_i32_0 : i32, i32
  }
  func.func @transform_4(%arg0: i32) -> (i32, i32) {
    %c0_i32 = arith.constant 0 : i32
    %c0_i32_0 = arith.constant 0 : i32
    %c0_i32_1 = arith.constant 0 : i32
    return %c0_i32, %c0_i32_0 : i32, i32
  }
  func.func @transform_5(%arg0: i32) -> (i32, i32) {
    %c0_i32 = arith.constant 0 : i32
    %c0_i32_0 = arith.constant 0 : i32
    %c0_i32_1 = arith.constant 0 : i32
    return %c0_i32, %c0_i32_0 : i32, i32
  }
  func.func @transform_6(%arg0: i32) -> (i32, i32) {
    %c0_i32 = arith.constant 0 : i32
    %c0_i32_0 = arith.constant 0 : i32
    %c0_i32_1 = arith.constant 0 : i32
    return %c0_i32, %c0_i32_0 : i32, i32
  }
  func.func @transform_7(%arg0: i32) -> (i32, i32) {
    %c0_i32 = arith.constant 0 : i32
    %c0_i32_0 = arith.constant 0 : i32
    return %arg0, %c0_i32 : i32, i32
  }
}

</mosaic_0001>

<bundles_post_ra>
// kernel: discriminator_forward.4
= control target key start
LH: loop header
LB: loop body
LE: loop exit
PB: predicated region body
PF: predicated region fallthrough
CT: control target
= control target key end

     0   :  { %s774_s1 = inlined_call_operand.vmem [shape: bf16[128,128], index: 1, kind: input, shape index: {}]   ;;  %s775_s0 = inlined_call_operand.vmem [shape: bf16[128,128], index: 0, kind: input, shape index: {}]   ;;  %s776_s2 = inlined_call_operand.vmem [shape: f32[1,128], index: 2, kind: input, shape index: {}]   ;;  %s777_s3 = inlined_call_operand.vmem [shape: f32[1,128], index: 3, kind: input, shape index: {}]   ;;  %s778_s4 = inlined_call_operand.vmem [shape: f32[1,128], index: 4, kind: input, shape index: {}]   ;;  %s779_s5 = inlined_call_operand.vmem [shape: bf16[128,128], index: 5, kind: output, shape index: {}]  }
   0x1   :  { %v593_v0 = vld [vmem:[%s774_s1] sm:$0xff]   ;;  %v594_v1 = vld [vmem:[%s774_s1 + $0x8] sm:$0xff]   ;;  %v595_v2 = vld [vmem:[%s774_s1 + $0x10] sm:$0xff]  }
   0x2   :  { %545 = vmatprep.subr.bf16.mxu0 %v593_v0  ;;  %577 = vmatprep.subr.bf16.mxu1 %v593_v0  ;;  %v596_v3 = vld [vmem:[%s774_s1 + $0x18] sm:$0xff]   ;;  %v601_v4 = vld [vmem:[%s775_s0] sm:$0xff]   ;;  %v598_v7 = vld [vmem:[%s774_s1 + $0x28] sm:$0xff]  }
   0x3   :  { %546 = vmatpush3.bf16.msra.mxu0 %v593_v0  ;;  %585 = vmatpush3.bf16.msra.mxu1 %v593_v0  ;;  %v602_v5 = vld [vmem:[%s775_s0 + $0x20] sm:$0xff]   ;;  %v599_v8 = vld [vmem:[%s774_s1 + $0x30] sm:$0xff]   ;;  %v600_v9 = vld [vmem:[%s774_s1 + $0x38] sm:$0xff]  }
   0x4   :  { %547 = vmatprep.subr.bf16.mxu0 %v594_v1  ;;  %578 = vmatprep.subr.bf16.mxu1 %v594_v1  ;;  %v597_v6 = vld [vmem:[%s774_s1 + $0x20] sm:$0xff]   ;;  %v603_v10 = vld [vmem:[%s775_s0 + $0x8] sm:$0xff]   ;;  %v605_v12 = vld [vmem:[%s775_s0 + $0x10] sm:$0xff]  }
   0x5   :  { %561 = vmatprep.mubr.bf16.mxu0 %v601_v4  ;;  %569 = vmatprep.mubr.bf16.mxu1 %v602_v5  ;;  %v604_v11 = vld [vmem:[%s775_s0 + $0x28] sm:$0xff]   ;;  %v606_v13 = vld [vmem:[%s775_s0 + $0x30] sm:$0xff]   ;;  %v607_v14 = vld [vmem:[%s775_s0 + $0x18] sm:$0xff]  }
   0x6   :  { %v608_v15 = vld [vmem:[%s775_s0 + $0x38] sm:$0xff]   ;;  %v690_v16 = vld [vmem:[%s776_s2] ss:$0 sm:$0xff] }
   0x7   :  { %548 = vmatpush3.bf16.msra.mxu0 %v594_v1  ;;  %586 = vmatpush3.bf16.msra.mxu1 %v594_v1  ;;  %v697_v23 = vld [vmem:[%s777_s3] ss:$0 sm:$0xff] }
   0x8   :  { %549 = vmatprep.subr.bf16.mxu0 %v595_v2  ;;  %579 = vmatprep.subr.bf16.mxu1 %v595_v2  ;;  %v707_v41 = vld [vmem:[%s778_s4] ss:$0 sm:$0xff] }
   0xb   :  { %550 = vmatpush3.bf16.msra.mxu0 %v595_v2  ;;  %587 = vmatpush3.bf16.msra.mxu1 %v595_v2 }
   0xc   :  { %551 = vmatprep.subr.bf16.mxu0 %v596_v3  ;;  %580 = vmatprep.subr.bf16.mxu1 %v596_v3 }
   0xf   :  { %552 = vmatpush3.bf16.msra.mxu0 %v596_v3  ;;  %588 = vmatpush3.bf16.msra.mxu1 %v596_v3 }
  0x10   :  { %553 = vmatprep.subr.bf16.mxu0 %v597_v6  ;;  %581 = vmatprep.subr.bf16.mxu1 %v597_v6 }
  0x13   :  { %554 = vmatpush3.bf16.msra.mxu0 %v597_v6  ;;  %589 = vmatpush3.bf16.msra.mxu1 %v597_v6 }
  0x14   :  { %555 = vmatprep.subr.bf16.mxu0 %v598_v7  ;;  %582 = vmatprep.subr.bf16.mxu1 %v598_v7 }
  0x17   :  { %556 = vmatpush3.bf16.msra.mxu0 %v598_v7  ;;  %590 = vmatpush3.bf16.msra.mxu1 %v598_v7 }
  0x18   :  { %557 = vmatprep.subr.bf16.mxu0 %v599_v8  ;;  %583 = vmatprep.subr.bf16.mxu1 %v599_v8 }
  0x1b   :  { %558 = vmatpush3.bf16.msra.mxu0 %v599_v8  ;;  %591 = vmatpush3.bf16.msra.mxu1 %v599_v8 }
  0x1c   :  { %559 = vmatprep.subr.bf16.mxu0 %v600_v9  ;;  %584 = vmatprep.subr.bf16.mxu1 %v600_v9 }
  0x1f   :  { %560 = vmatpush3.bf16.msra.mxu0 %v600_v9  ;;  %592 = vmatpush3.bf16.msra.mxu1 %v600_v9 }
  0x22   :  { %562 = vmatmul.mubr.bf16.vlgmr.msra.gmra.mrb[0].mxu0 %v603_v10  ;;  %570 = vmatmul.mubr.bf16.vlgmr.msra.gmra.mrb[0].mxu1 %v604_v11 }
  0x23   :  { %565 = vmatprep.mubr.bf16.mxu0 %v605_v12  ;;  %573 = vmatprep.mubr.bf16.mxu1 %v606_v13 }
  0x2a   :  { %566 = vmatmul.mubr.bf16.gmra.mrb[4].mxu0 %v607_v14  ;;  %574 = vmatmul.mubr.bf16.gmra.mrb[4].mxu1 %v608_v15 }
  0xf5   :  { %v563_v17 = vpop.f32.mrb[0].mxu0  ;;  %v571_v18 = vpop.f32.mrb[0].mxu1 }
  0xf6   :  { %v199_v19 = vadd.f32 %v563_v17, %v690_v16  ;;  %v231_v20 = vadd.f32 %v571_v18, %v690_v16  ;;  %v190_v21 = vpop.f32.mrb[1].mxu0  ;;  %v222_v22 = vpop.f32.mrb[1].mxu1 }
  0xf7   :  { %v191_v24 = vadd.f32 %v690_v16, %v190_v21  ;;  %v223_v25 = vadd.f32 %v690_v16, %v222_v22  ;;  %v564_v26 = vpop.f32.mrb[2].mxu0  ;;  %v572_v27 = vpop.f32.mrb[2].mxu1 }
  0xf8   :  { %vm255_vm0 = vcmp.ge.f32.partialorder %v199_v19, 0.0  ;;  %v271_v28 = vmul.f32 0.2, %v199_v19  ;;  %vm263_vm1 = vcmp.ge.f32.partialorder %v231_v20, 0.0  ;;  %v279_v29 = vmul.f32 0.2, %v231_v20 }
  0xf9   :  { %vm253_vm2 = vcmp.ge.f32.partialorder %v191_v24, 0.0  ;;  %v269_v30 = vmul.f32 0.2, %v191_v24  ;;  %vm261_vm3 = vcmp.ge.f32.partialorder %v223_v25, 0.0  ;;  %v277_v31 = vmul.f32 0.2, %v223_v25 }
  0xfa   :  { %v287_v32 = vsel %vm255_vm0, %v199_v19, %v271_v28  ;;  %v295_v33 = vsel %vm263_vm1, %v231_v20, %v279_v29  ;;  %v202_v34 = vadd.f32 %v564_v26, %v690_v16  ;;  %v234_v35 = vadd.f32 %v572_v27, %v690_v16  ;;  %v193_v36 = vpop.f32.mrb[3].mxu0  ;;  %v225_v37 = vpop.f32.mrb[3].mxu1 }
  0xfb   :  { %v285_v38 = vsel %vm253_vm2, %v191_v24, %v269_v30  ;;  %v293_v39 = vsel %vm261_vm3, %v223_v25, %v277_v31  ;;  %v310_v40 = vmul.f32 %v697_v23, %v287_v32  ;;  %v318_v43 = vmul.f32 %v697_v23, %v295_v33 }
  0xfc   :  { %vm256_vm4 = vcmp.ge.f32.partialorder %v202_v34, 0.0  ;;  %v272_v42 = vmul.f32 0.2, %v202_v34  ;;  %vm264_vm5 = vcmp.ge.f32.partialorder %v234_v35, 0.0  ;;  %v280_v44 = vmul.f32 0.2, %v234_v35 }
  0xfd   :  { %v567_v45 = vpop.f32.mrb[4].mxu0  ;;  %v575_v46 = vpop.f32.mrb[4].mxu1  ;;  %v308_v47 = vmul.f32 %v697_v23, %v285_v38  ;;  %v316_v48 = vmul.f32 %v697_v23, %v293_v39  ;;  %v194_v50 = vadd.f32 %v690_v16, %v193_v36  ;;  %v226_v55 = vadd.f32 %v690_v16, %v225_v37 }
  0xfe   :  { %v288_v49 = vsel %vm256_vm4, %v202_v34, %v272_v42  ;;  %v206_v51 = vpop.f32.mrb[5].mxu0  ;;  %v238_v52 = vpop.f32.mrb[5].mxu1  ;;  %v296_v54 = vsel %vm264_vm5, %v234_v35, %v280_v44  ;;  %v215_v56 = vadd.f32 %v567_v45, %v690_v16  ;;  %v333_v59 = vadd.f32 %v707_v41, %v310_v40 }
  0xff   :  { %v311_v53 = vmul.f32 %v697_v23, %v288_v49  ;;  %v568_v57 = vpop.f32.mrb[6].mxu0  ;;  %v576_v58 = vpop.f32.mrb[6].mxu1  ;;  %v319_v60 = vmul.f32 %v697_v23, %v296_v54  ;;  %vm254_vm6 = vcmp.ge.f32.partialorder %v194_v50, 0.0  ;;  %v270_v61 = vmul.f32 0.2, %v194_v50 }
 0x100   :  { %v209_v62 = vpop.f32.mrb[7].mxu0  ;;  %v241_v63 = vpop.f32.mrb[7].mxu1  ;;  %vm262_vm7 = vcmp.ge.f32.partialorder %v226_v55, 0.0  ;;  %v278_v1 = vmul.f32 0.2, %v226_v55  ;;  %v247_v2 = vadd.f32 %v575_v46, %v690_v16  ;;  %v341_v3 = vadd.f32 %v707_v41, %v318_v43 }
 0x101   :  { %v334_v0 = vadd.f32 %v707_v41, %v311_v53  ;;  %v342_v4 = vadd.f32 %v707_v41, %v319_v60  ;;  %v286_v5 = vsel %vm254_vm6, %v194_v50, %v270_v61  ;;  %v275_v6 = vmul.f32 0.2, %v215_v56 }
 0x102   :  { %v309_v8 = vmul.f32 %v697_v23, %v286_v5  ;;  %v294_v9 = vsel %vm262_vm7, %v226_v55, %v278_v1  ;;  %vm259_vm8 = vcmp.ge.f32.partialorder %v215_v56, 0.0  ;;  %v331_v10 = vadd.f32 %v707_v41, %v308_v47 }
 0x103   :  { %v490_v7 = vpack.c.bf16 %v334_v0, %v333_v59  ;;  %v510_v11 = vpack.c.bf16 %v342_v4, %v341_v3  ;;  %v317_v12 = vmul.f32 %v697_v23, %v294_v9  ;;  %v207_v13 = vadd.f32 %v690_v16, %v206_v51 }
 0x104   :  { %v339_v14 = vadd.f32 %v707_v41, %v316_v48  ;;  %v332_v15 = vadd.f32 %v707_v41, %v309_v8  ;;  %v283_v17 = vmul.f32 0.2, %v247_v2  ;;  %v239_v18 = vadd.f32 %v690_v16, %v238_v52 }
 0x105   :  { %522 = vst [vmem:[%s779_s5 + $0x8] sm:$0xff] %v490_v7   ;;  %526 = vst [vmem:[%s779_s5 + $0x28] sm:$0xff] %v510_v11   ;;  %v340_v19 = vadd.f32 %v707_v41, %v317_v12  ;;  %v291_v20 = vsel %vm259_vm8, %v215_v56, %v275_v6  ;;  %vm267_vm9 = vcmp.ge.f32.partialorder %v247_v2, 0.0  ;;  %v273_v21 = vmul.f32 0.2, %v207_v13 }
 0x106   :  { %v485_v22 = vpack.c.bf16 %v332_v15, %v331_v10  ;;  %vm257_vm10 = vcmp.ge.f32.partialorder %v207_v13, 0.0  ;;  %v281_v24 = vmul.f32 0.2, %v239_v18  ;;  %vm265_vm11 = vcmp.ge.f32.partialorder %v239_v18, 0.0 }
 0x107   :  { %v505_v25 = vpack.c.bf16 %v340_v19, %v339_v14  ;;  %v218_v26 = vadd.f32 %v568_v57, %v690_v16  ;;  %v314_v27 = vmul.f32 %v697_v23, %v291_v20  ;;  %v299_v28 = vsel %vm267_vm9, %v247_v2, %v283_v17 }
 0x108   :  { %486 = vst [vmem:[%s779_s5] sm:$0xff] %v485_v22   ;;  %v250_v29 = vadd.f32 %v576_v58, %v690_v16  ;;  %v210_v30 = vadd.f32 %v690_v16, %v209_v62  ;;  %v289_v31 = vsel %vm257_vm10, %v207_v13, %v273_v21  ;;  %v242_v33 = vadd.f32 %v690_v16, %v241_v63 }
 0x109   :  { %525 = vst [vmem:[%s779_s5 + $0x20] sm:$0xff] %v505_v25   ;;  %vm260_vm12 = vcmp.ge.f32.partialorder %v218_v26, 0.0  ;;  %v276_v32 = vmul.f32 0.2, %v218_v26  ;;  %v297_v34 = vsel %vm265_vm11, %v239_v18, %v281_v24  ;;  %v322_v36 = vmul.f32 %v697_v23, %v299_v28 }
 0x10a   :  { %vm268_vm13 = vcmp.ge.f32.partialorder %v250_v29, 0.0  ;;  %v284_v35 = vmul.f32 0.2, %v250_v29  ;;  %vm258_vm14 = vcmp.ge.f32.partialorder %v210_v30, 0.0  ;;  %v274_v38 = vmul.f32 0.2, %v210_v30 }
 0x10b   :  { %v292_v37 = vsel %vm260_vm12, %v218_v26, %v276_v32  ;;  %vm266_vm15 = vcmp.ge.f32.partialorder %v242_v33, 0.0  ;;  %v312_v39 = vmul.f32 %v697_v23, %v289_v31  ;;  %v282_v43 = vmul.f32 0.2, %v242_v33 }
 0x10c   :  { %v315_v40 = vmul.f32 %v697_v23, %v292_v37  ;;  %v300_v42 = vsel %vm268_vm13, %v250_v29, %v284_v35  ;;  %v320_v44 = vmul.f32 %v697_v23, %v297_v34  ;;  %v290_v16 = vsel %vm258_vm14, %v210_v30, %v274_v38 }
 0x10d   :  { %v323_v45 = vmul.f32 %v697_v23, %v300_v42  ;;  %v337_v46 = vadd.f32 %v707_v41, %v314_v27  ;;  %v313_v48 = vmul.f32 %v697_v23, %v290_v16  ;;  %v298_v49 = vsel %vm266_vm15, %v242_v33, %v282_v43 }
 0x10e   :  { %v338_v47 = vadd.f32 %v707_v41, %v315_v40  ;;  %v345_v50 = vadd.f32 %v707_v41, %v322_v36  ;;  %v321_v52 = vmul.f32 %v697_v23, %v298_v49  ;;  %v335_v53 = vadd.f32 %v707_v41, %v312_v39 }
 0x10f   :  { %v346_v51 = vadd.f32 %v707_v41, %v323_v45  ;;  %v336_v55 = vadd.f32 %v707_v41, %v313_v48  ;;  %v343_v56 = vadd.f32 %v707_v41, %v320_v44 }
 0x110   :  { %v500_v54 = vpack.c.bf16 %v338_v47, %v337_v46  ;;  %v344_v58 = vadd.f32 %v707_v41, %v321_v52 }
 0x111   :  { %v520_v57 = vpack.c.bf16 %v346_v51, %v345_v50  ;;  %v495_v59 = vpack.c.bf16 %v336_v55, %v335_v53 }
 0x112   :  { %524 = vst [vmem:[%s779_s5 + $0x18] sm:$0xff] %v500_v54   ;;  %v515_v23 = vpack.c.bf16 %v344_v58, %v343_v56 }
 0x113   :  { %528 = vst [vmem:[%s779_s5 + $0x38] sm:$0xff] %v520_v57   ;;  %523 = vst [vmem:[%s779_s5 + $0x10] sm:$0xff] %v495_v59  }
 0x114   :  { %527 = vst [vmem:[%s779_s5 + $0x30] sm:$0xff] %v515_v23  }

// kernel: discriminator_forward.5
= control target key start
LH: loop header
LB: loop body
LE: loop exit
PB: predicated region body
PF: predicated region fallthrough
CT: control target
= control target key end

     0   :  { %s1686_s1 = inlined_call_operand.vmem [shape: bf16[1152,128], index: 1, kind: input, shape index: {}]   ;;  %s1687_s0 = inlined_call_operand.vmem [shape: bf16[32,1152], index: 0, kind: input, shape index: {}]   ;;  %s1688_s2 = inlined_call_operand.vmem [shape: f32[1,128], index: 2, kind: input, shape index: {}]   ;;  %s1689_s3 = inlined_call_operand.vmem [shape: f32[1,128], index: 3, kind: input, shape index: {}]   ;;  %s1690_s4 = inlined_call_operand.vmem [shape: f32[1,128], index: 4, kind: input, shape index: {}]   ;;  %s1691_s5 = inlined_call_operand.vmem [shape: bf16[32,128], index: 5, kind: output, shape index: {}]  }
   0x1   :  { %v1273_v0 = vld [vmem:[%s1686_s1 + $0x40] sm:$0xff]   ;;  %v1277_v4 = vld [vmem:[%s1686_s1 + $0x48] sm:$0xff]   ;;  %v1281_v8 = vld [vmem:[%s1686_s1 + $0x50] sm:$0xff]  }
   0x2   :  { %v1274_v1 = vld [vmem:[%s1686_s1] sm:$0xff]   ;;  %1131 = vmatprep.subr.bf16.mxu0 %v1273_v0  ;;  %v1278_v5 = vld [vmem:[%s1686_s1 + $0x8] sm:$0xff]   ;;  %v1282_v9 = vld [vmem:[%s1686_s1 + $0x10] sm:$0xff]  }
   0x3   :  { %v1275_v2 = vld [vmem:[%s1686_s1 + $0xc0] sm:$0xff]   ;;  %1132 = vmatpush3.bf16.msra.mxu0 %v1274_v1  ;;  %v1279_v6 = vld [vmem:[%s1686_s1 + $0xc8] sm:$0xff]   ;;  %v1283_v10 = vld [vmem:[%s1686_s1 + $0xd0] sm:$0xff]  }
   0x4   :  { %v1276_v3 = vld [vmem:[%s1686_s1 + $0x80] sm:$0xff]   ;;  %1159 = vmatprep.subr.bf16.mxu1 %v1275_v2  ;;  %1133 = vmatprep.subr.bf16.mxu0 %v1277_v4  ;;  %v1280_v7 = vld [vmem:[%s1686_s1 + $0x88] sm:$0xff]   ;;  %v1284_v11 = vld [vmem:[%s1686_s1 + $0x90] sm:$0xff]  }
   0x5   :  { %1160 = vmatpush3.bf16.msra.mxu1 %v1276_v3  ;;  %v1285_v12 = vld [vmem:[%s1686_s1 + $0x58] sm:$0xff]   ;;  %v1289_v16 = vld [vmem:[%s1686_s1 + $0x60] sm:$0xff]   ;;  %v1293_v20 = vld [vmem:[%s1686_s1 + $0x68] sm:$0xff]  }
   0x6   :  { %1161 = vmatprep.subr.bf16.mxu1 %v1279_v6  ;;  %v1286_v13 = vld [vmem:[%s1686_s1 + $0x18] sm:$0xff]   ;;  %v1290_v17 = vld [vmem:[%s1686_s1 + $0x20] sm:$0xff]   ;;  %v1294_v21 = vld [vmem:[%s1686_s1 + $0x28] sm:$0xff]  }
   0x7   :  { %1134 = vmatpush3.bf16.msra.mxu0 %v1278_v5  ;;  %v1287_v14 = vld [vmem:[%s1686_s1 + $0xd8] sm:$0xff]   ;;  %v1291_v18 = vld [vmem:[%s1686_s1 + $0xe0] sm:$0xff]   ;;  %v1295_v22 = vld [vmem:[%s1686_s1 + $0xe8] sm:$0xff]  }
   0x8   :  { %1135 = vmatprep.subr.bf16.mxu0 %v1281_v8  ;;  %v1288_v15 = vld [vmem:[%s1686_s1 + $0x98] sm:$0xff]   ;;  %v1292_v19 = vld [vmem:[%s1686_s1 + $0xa0] sm:$0xff]   ;;  %v1296_v23 = vld [vmem:[%s1686_s1 + $0xa8] sm:$0xff]  }
   0x9   :  { %1162 = vmatpush3.bf16.msra.mxu1 %v1280_v7  ;;  %v1297_v24 = vld [vmem:[%s1686_s1 + $0x70] sm:$0xff]   ;;  %v1301_v28 = vld [vmem:[%s1686_s1 + $0x78] sm:$0xff]   ;;  %v1304_v31 = vld [vmem:[%s1687_s0] ss:$36 sps:$4 sm:$0xff]  }
   0xa   :  { %1163 = vmatprep.subr.bf16.mxu1 %v1283_v10  ;;  %v1298_v25 = vld [vmem:[%s1686_s1 + $0x30] sm:$0xff]   ;;  %v1302_v29 = vld [vmem:[%s1686_s1 + $0x38] sm:$0xff]   ;;  %v1306_v32 = vld [vmem:[%s1687_s0 + $0x4] ss:$36 sps:$4 sm:$0xff]  }
   0xb   :  { %1136 = vmatpush3.bf16.msra.mxu0 %v1282_v9  ;;  %v1299_v26 = vld [vmem:[%s1686_s1 + $0xf0] sm:$0xff]   ;;  %v1303_v30 = vld [vmem:[%s1686_s1 + $0xf8] sm:$0xff]   ;;  %748 = vmatprep.mubr.bf16.mxu0 %v1306_v32  ;;  %v1308_v34 = vld [vmem:[%s1686_s1 + $0x140] sm:$0xff]  }
   0xc   :  { %1137 = vmatprep.subr.bf16.mxu0 %v1285_v12  ;;  %v1300_v27 = vld [vmem:[%s1686_s1 + $0xb0] sm:$0xff]   ;;  %v1307_v33 = vld [vmem:[%s1686_s1 + $0xb8] sm:$0xff]   ;;  %v1309_v35 = vld [vmem:[%s1687_s0 + $0x8] ss:$36 sps:$4 sm:$0xff]  }
   0xd   :  { %1164 = vmatpush3.bf16.msra.mxu1 %v1284_v11  ;;  %v1311_v36 = vld [vmem:[%s1687_s0 + $0xc] ss:$36 sps:$4 sm:$0xff]   ;;  %v1312_v37 = vld [vmem:[%s1686_s1 + $0x100] sm:$0xff]   ;;  %v1323_v48 = vld [vmem:[%s1686_s1 + $0x158] sm:$0xff]  }
   0xe   :  { %1165 = vmatprep.subr.bf16.mxu1 %v1287_v14  ;;  %797 = vmatprep.mubr.bf16.mxu1 %v1311_v36  ;;  %v1313_v38 = vld [vmem:[%s1686_s1 + $0x1c0] sm:$0xff]   ;;  %v1315_v40 = vld [vmem:[%s1686_s1 + $0x148] sm:$0xff]   ;;  %v1319_v44 = vld [vmem:[%s1686_s1 + $0x150] sm:$0xff]  }
   0xf   :  { %1138 = vmatpush3.bf16.msra.mxu0 %v1286_v13  ;;  %v1314_v39 = vld [vmem:[%s1686_s1 + $0x180] sm:$0xff]   ;;  %v1316_v41 = vld [vmem:[%s1686_s1 + $0x108] sm:$0xff]   ;;  %v1320_v45 = vld [vmem:[%s1686_s1 + $0x110] sm:$0xff]  }
  0x10   :  { %1139 = vmatprep.subr.bf16.mxu0 %v1289_v16  ;;  %v1317_v42 = vld [vmem:[%s1686_s1 + $0x1c8] sm:$0xff]   ;;  %v1321_v46 = vld [vmem:[%s1686_s1 + $0x1d0] sm:$0xff]   ;;  %v1324_v49 = vld [vmem:[%s1686_s1 + $0x118] sm:$0xff]  }
  0x11   :  { %1166 = vmatpush3.bf16.msra.mxu1 %v1288_v15  ;;  %v1318_v43 = vld [vmem:[%s1686_s1 + $0x188] sm:$0xff]   ;;  %v1322_v47 = vld [vmem:[%s1686_s1 + $0x190] sm:$0xff]   ;;  %v1325_v50 = vld [vmem:[%s1686_s1 + $0x1d8] sm:$0xff]  }
  0x12   :  { %1167 = vmatprep.subr.bf16.mxu1 %v1291_v18  ;;  %v1326_v51 = vld [vmem:[%s1686_s1 + $0x198] sm:$0xff]   ;;  %v1327_v52 = vld [vmem:[%s1686_s1 + $0x160] sm:$0xff]   ;;  %v1331_v56 = vld [vmem:[%s1686_s1 + $0x168] sm:$0xff]  }
  0x13   :  { %1140 = vmatpush3.bf16.msra.mxu0 %v1290_v17  ;;  %v1328_v53 = vld [vmem:[%s1686_s1 + $0x120] sm:$0xff]   ;;  %v1332_v57 = vld [vmem:[%s1687_s0 + $0x4c] ss:$36 sps:$4 sm:$0xff]   ;;  %v1337_v61 = vld [vmem:[%s1687_s0 + $0x54] ss:$36 sps:$4 sm:$0xff]  }
  0x14   :  { %1141 = vmatprep.subr.bf16.mxu0 %v1293_v20  ;;  %v1329_v54 = vld [vmem:[%s1686_s1 + $0x1e0] sm:$0xff]   ;;  %v1334_v58 = vld [vmem:[%s1686_s1 + $0x128] sm:$0xff]   ;;  %v1340_v63 = vld [vmem:[%s1687_s0 + $0x50] ss:$36 sps:$4 sm:$0xff]  }
  0x15   :  { %1168 = vmatpush3.bf16.msra.mxu1 %v1292_v19  ;;  %v1330_v55 = vld [vmem:[%s1686_s1 + $0x1a0] sm:$0xff]   ;;  %v1335_v59 = vld [vmem:[%s1687_s0 + $0x48] ss:$36 sps:$4 sm:$0xff]   ;;  %v1341_v0 = vld [vmem:[%s1686_s1 + $0x170] sm:$0xff]  }
  0x16   :  { %1169 = vmatprep.subr.bf16.mxu1 %v1295_v22  ;;  %v1336_v60 = vld [vmem:[%s1686_s1 + $0x1e8] sm:$0xff]   ;;  %v1342_v1 = vld [vmem:[%s1686_s1 + $0x130] sm:$0xff]   ;;  %v1345_v4 = vld [vmem:[%s1686_s1 + $0x178] sm:$0xff]  }
  0x17   :  { %1142 = vmatpush3.bf16.msra.mxu0 %v1294_v21  ;;  %v1339_v62 = vld [vmem:[%s1686_s1 + $0x1a8] sm:$0xff]   ;;  %v1343_v2 = vld [vmem:[%s1686_s1 + $0x1f0] sm:$0xff]   ;;  %v1346_v5 = vld [vmem:[%s1686_s1 + $0x138] sm:$0xff]  }
  0x18   :  { %1143 = vmatprep.subr.bf16.mxu0 %v1297_v24  ;;  %v1344_v3 = vld [vmem:[%s1686_s1 + $0x1b0] sm:$0xff]   ;;  %v1347_v6 = vld [vmem:[%s1686_s1 + $0x1f8] sm:$0xff]   ;;  %v1352_v10 = vld [vmem:[%s1686_s1 + $0x200] sm:$0xff]  }
  0x19   :  { %1170 = vmatpush3.bf16.msra.mxu1 %v1296_v23  ;;  %v1348_v7 = vld [vmem:[%s1687_s0 + $0x10] ss:$36 sps:$4 sm:$0xff]   ;;  %v1351_v9 = vld [vmem:[%s1686_s1 + $0x1b8] sm:$0xff]   ;;  %v1356_v13 = vld [vmem:[%s1686_s1 + $0x208] sm:$0xff]  }
  0x1a   :  { %1171 = vmatprep.subr.bf16.mxu1 %v1299_v26  ;;  %v1350_v8 = vld [vmem:[%s1687_s0 + $0x14] ss:$36 sps:$4 sm:$0xff]   ;;  %v1355_v12 = vld [vmem:[%s1687_s0 + $0x1c] ss:$36 sps:$4 sm:$0xff]   ;;  %v1361_v17 = vld [vmem:[%s1687_s0 + $0x64] ss:$36 sps:$4 sm:$0xff]  }
  0x1b   :  { %1144 = vmatpush3.bf16.msra.mxu0 %v1298_v25  ;;  %v1353_v11 = vld [vmem:[%s1687_s0 + $0x18] ss:$36 sps:$4 sm:$0xff]   ;;  %v1360_v16 = vld [vmem:[%s1686_s1 + $0x210] sm:$0xff]   ;;  %v1363_v18 = vld [vmem:[%s1687_s0 + $0x60] ss:$36 sps:$4 sm:$0xff]  }
  0x1c   :  { %1145 = vmatprep.subr.bf16.mxu0 %v1301_v28  ;;  %v1357_v14 = vld [vmem:[%s1687_s0 + $0x5c] ss:$36 sps:$4 sm:$0xff]   ;;  %v1366_v22 = vld [vmem:[%s1686_s1 + $0x228] sm:$0xff]   ;;  %v1367_v23 = vld [vmem:[%s1686_s1 + $0x230] sm:$0xff]  }
  0x1d   :  { %1172 = vmatpush3.bf16.msra.mxu1 %v1300_v27  ;;  %v1359_v15 = vld [vmem:[%s1687_s0 + $0x58] ss:$36 sps:$4 sm:$0xff]   ;;  %v1365_v20 = vld [vmem:[%s1686_s1 + $0x220] sm:$0xff]   ;;  %v1370_v25 = vld [vmem:[%s1687_s0 + $0x68] ss:$36 sps:$4 sm:$0xff]  }
  0x1e   :  { %1173 = vmatprep.subr.bf16.mxu1 %v1303_v30  ;;  %v1364_v19 = vld [vmem:[%s1686_s1 + $0x218] sm:$0xff]   ;;  %v1369_v21 = vld [vmem:[%s1687_s0 + $0x20] ss:$36 sps:$4 sm:$0xff]  }
  0x1f   :  { %1146 = vmatpush3.bf16.msra.mxu0 %v1302_v29  ;;  %v1368_v24 = vld [vmem:[%s1686_s1 + $0x238] sm:$0xff]   ;;  %v1019_v27 = vld [vmem:[%s1688_s2] ss:$0 sm:$0xff] }
  0x20   :  { %1187 = vmatprep.subr.bf16.mxu0 %v1308_v34 }
  0x21   :  { %1174 = vmatpush3.bf16.msra.mxu1 %v1307_v33 }
  0x22   :  { %749 = vmatmul.mubr.bf16.vlgmr.msra.gmra.mrb[0].mxu0 %v1304_v31  ;;  %1215 = vmatprep.subr.bf16.mxu1 %v1313_v38 }
  0x23   :  { %1188 = vmatpush3.bf16.msra.mxu0 %v1312_v37  ;;  %756 = vmatprep.mubr.bf16.mxu0 %v1332_v57 }
  0x24   :  { %798 = vmatmul.mubr.bf16.vlgmr.msra.gmra.mrb[0].mxu1 %v1309_v35  ;;  %1189 = vmatprep.subr.bf16.mxu0 %v1315_v40 }
  0x25   :  { %1216 = vmatpush3.bf16.msra.mxu1 %v1314_v39  ;;  %805 = vmatprep.mubr.bf16.mxu1 %v1337_v61 }
  0x26   :  { %1217 = vmatprep.subr.bf16.mxu1 %v1317_v42 }
  0x27   :  { %1190 = vmatpush3.bf16.msra.mxu0 %v1316_v41 }
  0x28   :  { %1191 = vmatprep.subr.bf16.mxu0 %v1319_v44 }
  0x29   :  { %1218 = vmatpush3.bf16.msra.mxu1 %v1318_v43 }
  0x2a   :  { %1219 = vmatprep.subr.bf16.mxu1 %v1321_v46  ;;  %757 = vmatmul.mubr.bf16.gmra.mrb[4].mxu0 %v1335_v59 }
  0x2b   :  { %1192 = vmatpush3.bf16.msra.mxu0 %v1320_v45  ;;  %846 = vmatprep.mubr.bf16.mxu0 %v1350_v8 }
  0x2c   :  { %1193 = vmatprep.subr.bf16.mxu0 %v1323_v48  ;;  %806 = vmatmul.mubr.bf16.gmra.mrb[4].mxu1 %v1340_v63 }
  0x2d   :  { %1220 = vmatpush3.bf16.msra.mxu1 %v1322_v47  ;;  %895 = vmatprep.mubr.bf16.mxu1 %v1355_v12 }
  0x2e   :  { %1221 = vmatprep.subr.bf16.mxu1 %v1325_v50 }
  0x2f   :  { %1194 = vmatpush3.bf16.msra.mxu0 %v1324_v49 }
  0x30   :  { %1195 = vmatprep.subr.bf16.mxu0 %v1327_v52 }
  0x31   :  { %1222 = vmatpush3.bf16.msra.mxu1 %v1326_v51 }
  0x32   :  { %1223 = vmatprep.subr.bf16.mxu1 %v1329_v54 }
  0x33   :  { %1196 = vmatpush3.bf16.msra.mxu0 %v1328_v53 }
  0x34   :  { %1197 = vmatprep.subr.bf16.mxu0 %v1331_v56 }
  0x35   :  { %1224 = vmatpush3.bf16.msra.mxu1 %v1330_v55 }
  0x36   :  { %1225 = vmatprep.subr.bf16.mxu1 %v1336_v60 }
  0x37   :  { %1198 = vmatpush3.bf16.msra.mxu0 %v1334_v58 }
  0x38   :  { %1199 = vmatprep.subr.bf16.mxu0 %v1341_v0 }
  0x39   :  { %1226 = vmatpush3.bf16.msra.mxu1 %v1339_v62 }
  0x3a   :  { %1227 = vmatprep.subr.bf16.mxu1 %v1343_v2 }
  0x3b   :  { %1200 = vmatpush3.bf16.msra.mxu0 %v1342_v1 }
  0x3c   :  { %1201 = vmatprep.subr.bf16.mxu0 %v1345_v4 }
  0x3d   :  { %1228 = vmatpush3.bf16.msra.mxu1 %v1344_v3 }
  0x3e   :  { %1229 = vmatprep.subr.bf16.mxu1 %v1347_v6 }
  0x3f   :  { %1202 = vmatpush3.bf16.msra.mxu0 %v1346_v5 }
  0x40   :  { %1253 = vmatprep.subr.bf16.mxu0 %v1352_v10 }
  0x41   :  { %1230 = vmatpush3.bf16.msra.mxu1 %v1351_v9 }
  0x42   :  { %847 = vmatmul.mubr.bf16.vlgmr.msra.gmra.mrb[8].mxu0 %v1348_v7 }
  0x43   :  { %1254 = vmatpush3.bf16.msra.mxu0 %v1352_v10  ;;  %854 = vmatprep.mubr.bf16.mxu0 %v1357_v14 }
  0x44   :  { %896 = vmatmul.mubr.bf16.vlgmr.msra.gmra.mrb[8].mxu1 %v1353_v11  ;;  %1255 = vmatprep.subr.bf16.mxu0 %v1356_v13 }
  0x45   :  { %903 = vmatprep.mubr.bf16.mxu1 %v1361_v17 }
  0x47   :  { %1256 = vmatpush3.bf16.msra.mxu0 %v1356_v13 }
  0x48   :  { %1257 = vmatprep.subr.bf16.mxu0 %v1360_v16 }
  0x4a   :  { %855 = vmatmul.mubr.bf16.gmra.mrb[12].mxu0 %v1359_v15 }
  0x4b   :  { %1258 = vmatpush3.bf16.msra.mxu0 %v1360_v16  ;;  %1269 = vmatprep.mubr.bf16.mxu0 %v1369_v21 }
  0x4c   :  { %904 = vmatmul.mubr.bf16.gmra.mrb[12].mxu1 %v1363_v18  ;;  %1259 = vmatprep.subr.bf16.mxu0 %v1364_v19 }
  0x4f   :  { %1260 = vmatpush3.bf16.msra.mxu0 %v1364_v19 }
  0x50   :  { %1261 = vmatprep.subr.bf16.mxu0 %v1365_v20 }
  0x53   :  { %1262 = vmatpush3.bf16.msra.mxu0 %v1365_v20 }
  0x54   :  { %1263 = vmatprep.subr.bf16.mxu0 %v1366_v22 }
  0x57   :  { %1264 = vmatpush3.bf16.msra.mxu0 %v1366_v22 }
  0x58   :  { %1265 = vmatprep.subr.bf16.mxu0 %v1367_v23 }
  0x5b   :  { %1266 = vmatpush3.bf16.msra.mxu0 %v1367_v23 }
  0x5c   :  { %1267 = vmatprep.subr.bf16.mxu0 %v1368_v24 }
  0x5f   :  { %1268 = vmatpush3.bf16.msra.mxu0 %v1368_v24 }
  0x62   :  { %1270 = vmatmul.mubr.bf16.vlgmr.msra.gmra.mrb[16].mxu0 %v1370_v25 }
  0xf5   :  { %v1147_v26 = vpop.f32.mrb[0].mxu0 }
  0xf6   :  { %v1148_v28 = vpop.f32.mrb[1].mxu0 }
  0xf7   :  { %v1149_v29 = vadd.f32 %v1148_v28, %v1147_v26  ;;  %v1150_v30 = vpop.f32.mrb[2].mxu0  ;;  %v1175_v31 = vpop.f32.mrb[0].mxu1 }
  0xf8   :  { %v1151_v32 = vpop.f32.mrb[3].mxu0  ;;  %v1176_v35 = vpop.f32.mrb[1].mxu1 }
  0xf9   :  { %v751_v33 = vadd.f32 %v1149_v29, %v1019_v27  ;;  %v1152_v34 = vadd.f32 %v1151_v32, %v1150_v30  ;;  %v1177_v36 = vadd.f32 %v1176_v35, %v1175_v31  ;;  %v1178_v37 = vpop.f32.mrb[2].mxu1 }
  0xfa   :  { %v1179_v39 = vpop.f32.mrb[3].mxu1 }
  0xfb   :  { %v754_v38 = vadd.f32 %v1152_v34, %v1019_v27  ;;  %v800_v40 = vadd.f32 %v1177_v36, %v751_v33  ;;  %v1180_v41 = vadd.f32 %v1179_v39, %v1178_v37  ;;  %v1110_v33 = vld [vmem:[%s1689_s3] ss:$0 sm:$0xff] }
  0xfd   :  { %v803_v42 = vadd.f32 %v1180_v41, %v754_v38  ;;  %v1153_v43 = vpop.f32.mrb[4].mxu0 }
  0xfe   :  { %v1154_v44 = vpop.f32.mrb[5].mxu0 }
  0xff   :  { %v1155_v45 = vadd.f32 %v1154_v44, %v1153_v43  ;;  %v1156_v46 = vpop.f32.mrb[6].mxu0  ;;  %v1181_v47 = vpop.f32.mrb[4].mxu1  ;;  %v1111_v43 = vld [vmem:[%s1690_s4] ss:$0 sm:$0xff] }
 0x100   :  { %v1157_v48 = vpop.f32.mrb[7].mxu0  ;;  %v1182_v51 = vpop.f32.mrb[5].mxu1 }
 0x101   :  { %v759_v49 = vadd.f32 %v1155_v45, %v1019_v27  ;;  %v1158_v50 = vadd.f32 %v1157_v48, %v1156_v46  ;;  %v1183_v52 = vadd.f32 %v1182_v51, %v1181_v47  ;;  %v1184_v53 = vpop.f32.mrb[6].mxu1 }
 0x102   :  { %v1185_v55 = vpop.f32.mrb[7].mxu1 }
 0x103   :  { %v762_v54 = vadd.f32 %v1158_v50, %v1019_v27  ;;  %v808_v56 = vadd.f32 %v1183_v52, %v759_v49  ;;  %v1186_v57 = vadd.f32 %v1185_v55, %v1184_v53 }
 0x105   :  { %v811_v58 = vadd.f32 %v1186_v57, %v762_v54 }
 0x115   :  { %v1203_v59 = vpop.f32.mrb[8].mxu0 }
 0x116   :  { %v1204_v60 = vpop.f32.mrb[9].mxu0 }
 0x117   :  { %v1205_v61 = vadd.f32 %v1204_v60, %v1203_v59  ;;  %v1206_v62 = vpop.f32.mrb[10].mxu0  ;;  %v1231_v63 = vpop.f32.mrb[8].mxu1 }
 0x118   :  { %v1207_v0 = vpop.f32.mrb[11].mxu0  ;;  %v1232_v3 = vpop.f32.mrb[9].mxu1 }
 0x119   :  { %v849_v1 = vadd.f32 %v1205_v61, %v800_v40  ;;  %v1208_v2 = vadd.f32 %v1207_v0, %v1206_v62  ;;  %v1233_v4 = vadd.f32 %v1232_v3, %v1231_v63  ;;  %v1234_v5 = vpop.f32.mrb[10].mxu1 }
 0x11a   :  { %v1235_v7 = vpop.f32.mrb[11].mxu1 }
 0x11b   :  { %v852_v6 = vadd.f32 %v1208_v2, %v803_v42  ;;  %v1236_v8 = vadd.f32 %v1235_v7, %v1234_v5  ;;  %v898_v9 = vadd.f32 %v1233_v4, %v849_v1 }
 0x11d   :  { %v1209_v10 = vpop.f32.mrb[12].mxu0  ;;  %v901_v12 = vadd.f32 %v1236_v8, %v852_v6 }
 0x11e   :  { %v1210_v11 = vpop.f32.mrb[13].mxu0 }
 0x11f   :  { %v1211_v13 = vadd.f32 %v1210_v11, %v1209_v10  ;;  %v1212_v14 = vpop.f32.mrb[14].mxu0  ;;  %v1237_v15 = vpop.f32.mrb[12].mxu1 }
 0x120   :  { %v1213_v16 = vpop.f32.mrb[15].mxu0  ;;  %v1238_v19 = vpop.f32.mrb[13].mxu1 }
 0x121   :  { %v857_v17 = vadd.f32 %v1211_v13, %v808_v56  ;;  %v1214_v18 = vadd.f32 %v1213_v16, %v1212_v14  ;;  %v1239_v20 = vadd.f32 %v1238_v19, %v1237_v15  ;;  %v1240_v21 = vpop.f32.mrb[14].mxu1 }
 0x122   :  { %v1241_v23 = vpop.f32.mrb[15].mxu1 }
 0x123   :  { %v860_v22 = vadd.f32 %v1214_v18, %v811_v58  ;;  %v1242_v24 = vadd.f32 %v1241_v23, %v1240_v21  ;;  %v906_v25 = vadd.f32 %v1239_v20, %v857_v17 }
 0x125   :  { %v909_v26 = vadd.f32 %v1242_v24, %v860_v22 }
 0x135   :  { %v1271_v27 = vpop.f32.mrb[16].mxu0 }
 0x136   :  { %v955_v28 = vadd.f32 %v1271_v27, %v906_v25  ;;  %v946_v29 = vpop.f32.mrb[17].mxu0 }
 0x137   :  { %v947_v30 = vadd.f32 %v946_v29, %v898_v9  ;;  %v1272_v31 = vpop.f32.mrb[18].mxu0 }
 0x138   :  { %vm963_vm0 = vcmp.ge.f32.partialorder %v955_v28, 0.0  ;;  %v967_v32 = vmul.f32 0.2, %v955_v28  ;;  %v958_v34 = vadd.f32 %v1272_v31, %v909_v26  ;;  %v949_v35 = vpop.f32.mrb[19].mxu0 }
 0x139   :  { %vm961_vm1 = vcmp.ge.f32.partialorder %v947_v30, 0.0  ;;  %v965_v36 = vmul.f32 0.2, %v947_v30  ;;  %v950_v37 = vadd.f32 %v949_v35, %v901_v12 }
 0x13a   :  { %v971_v38 = vsel %vm963_vm0, %v955_v28, %v967_v32  ;;  %vm964_vm2 = vcmp.ge.f32.partialorder %v958_v34, 0.0  ;;  %v968_v39 = vmul.f32 0.2, %v958_v34 }
 0x13b   :  { %v982_v40 = vmul.f32 %v1110_v33, %v971_v38  ;;  %v969_v41 = vsel %vm961_vm1, %v947_v30, %v965_v36  ;;  %vm962_vm3 = vcmp.ge.f32.partialorder %v950_v37, 0.0  ;;  %v966_v42 = vmul.f32 0.2, %v950_v37 }
 0x13c   :  { %v980_v44 = vmul.f32 %v1110_v33, %v969_v41  ;;  %v972_v45 = vsel %vm964_vm2, %v958_v34, %v968_v39 }
 0x13d   :  { %v983_v46 = vmul.f32 %v1110_v33, %v972_v45  ;;  %v970_v47 = vsel %vm962_vm3, %v950_v37, %v966_v42  ;;  %v993_v49 = vadd.f32 %v1111_v43, %v982_v40 }
 0x13e   :  { %v981_v48 = vmul.f32 %v1110_v33, %v970_v47  ;;  %v991_v51 = vadd.f32 %v1111_v43, %v980_v44 }
 0x13f   :  { %v994_v50 = vadd.f32 %v1111_v43, %v983_v46 }
 0x140   :  { %v992_v52 = vadd.f32 %v1111_v43, %v981_v48 }
 0x141   :  { %v1128_v53 = vpack.c.bf16 %v994_v50, %v993_v49 }
 0x142   :  { %v1123_v54 = vpack.c.bf16 %v992_v52, %v991_v51 }
 0x143   :  { %1130 = vst [vmem:[%s1691_s5 + $0x8] sm:$0xff] %v1128_v53  }
 0x144   :  { %1124 = vst [vmem:[%s1691_s5] sm:$0xff] %v1123_v54  }

// kernel: discriminator_forward.6
= control target key start
LH: loop header
LB: loop body
LE: loop exit
PB: predicated region body
PF: predicated region fallthrough
CT: control target
= control target key end

     0   :  { %vm1151_vm0 = vmmov 0   ;;  %s1425_s1 = inlined_call_operand.vmem [shape: bf16[1152,128], index: 1, kind: input, shape index: {}]   ;;  %s1426_s0 = inlined_call_operand.vmem [shape: bf16[8,1152], index: 0, kind: input, shape index: {}]   ;;  %s1427_s2 = inlined_call_operand.vmem [shape: f32[1,128], index: 2, kind: input, shape index: {}]   ;;  %s1428_s3 = inlined_call_operand.vmem [shape: f32[1,128], index: 3, kind: input, shape index: {}]   ;;  %s1429_s4 = inlined_call_operand.vmem [shape: f32[1,128], index: 4, kind: input, shape index: {}]   ;;  %s1430_s5 = inlined_call_operand.vmem [shape: bf16[8,128], index: 5, kind: output, shape index: {}]  }
   0x1   :  { %v1069_v0 = vld [vmem:[%s1425_s1 + $0x40] sm:$0xff]   ;;  %v1073_v4 = vld [vmem:[%s1425_s1 + $0x48] sm:$0xff]   ;;  %v1077_v8 = vld [vmem:[%s1425_s1 + $0x50] sm:$0xff]  }
   0x2   :  { %v1070_v1 = vld [vmem:[%s1425_s1] sm:$0xff]   ;;  %950 = vmatprep.subr.bf16.mxu0 %v1069_v0  ;;  %v1074_v5 = vld [vmem:[%s1425_s1 + $0x8] sm:$0xff]   ;;  %v1078_v9 = vld [vmem:[%s1425_s1 + $0x10] sm:$0xff]  }
   0x3   :  { %v1071_v2 = vld [vmem:[%s1425_s1 + $0xc0] sm:$0xff]   ;;  %951 = vmatpush3.bf16.msra.mxu0 %v1070_v1  ;;  %v1075_v6 = vld [vmem:[%s1425_s1 + $0xc8] sm:$0xff]   ;;  %v1079_v10 = vld [vmem:[%s1425_s1 + $0xd0] sm:$0xff]  }
   0x4   :  { %v1072_v3 = vld [vmem:[%s1425_s1 + $0x80] sm:$0xff]   ;;  %972 = vmatprep.subr.bf16.mxu1 %v1071_v2  ;;  %952 = vmatprep.subr.bf16.mxu0 %v1073_v4  ;;  %v1076_v7 = vld [vmem:[%s1425_s1 + $0x88] sm:$0xff]   ;;  %v1080_v11 = vld [vmem:[%s1425_s1 + $0x90] sm:$0xff]  }
   0x5   :  { %973 = vmatpush3.bf16.msra.mxu1 %v1072_v3  ;;  %v1081_v12 = vld [vmem:[%s1425_s1 + $0x58] sm:$0xff]   ;;  %v1085_v16 = vld [vmem:[%s1425_s1 + $0x60] sm:$0xff]   ;;  %v1089_v20 = vld [vmem:[%s1425_s1 + $0x68] sm:$0xff]  }
   0x6   :  { %974 = vmatprep.subr.bf16.mxu1 %v1075_v6  ;;  %v1082_v13 = vld [vmem:[%s1425_s1 + $0x18] sm:$0xff]   ;;  %v1086_v17 = vld [vmem:[%s1425_s1 + $0x20] sm:$0xff]   ;;  %v1090_v21 = vld [vmem:[%s1425_s1 + $0x28] sm:$0xff]  }
   0x7   :  { %953 = vmatpush3.bf16.msra.mxu0 %v1074_v5  ;;  %v1083_v14 = vld [vmem:[%s1425_s1 + $0xd8] sm:$0xff]   ;;  %v1087_v18 = vld [vmem:[%s1425_s1 + $0xe0] sm:$0xff]   ;;  %v1091_v22 = vld [vmem:[%s1425_s1 + $0xe8] sm:$0xff]  }
   0x8   :  { %954 = vmatprep.subr.bf16.mxu0 %v1077_v8  ;;  %v1084_v15 = vld [vmem:[%s1425_s1 + $0x98] sm:$0xff]   ;;  %v1088_v19 = vld [vmem:[%s1425_s1 + $0xa0] sm:$0xff]   ;;  %v1092_v23 = vld [vmem:[%s1425_s1 + $0xa8] sm:$0xff]  }
   0x9   :  { %975 = vmatpush3.bf16.msra.mxu1 %v1076_v7  ;;  %v1093_v24 = vld [vmem:[%s1425_s1 + $0x70] sm:$0xff]   ;;  %v1097_v28 = vld [vmem:[%s1425_s1 + $0x78] sm:$0xff]   ;;  %v21_v31 = vld [vmem:[%s1426_s0] sm:$0xff] }
   0xa   :  { %976 = vmatprep.subr.bf16.mxu1 %v1079_v10  ;;  %v1094_v25 = vld [vmem:[%s1425_s1 + $0x30] sm:$0xff]   ;;  %v1098_v29 = vld [vmem:[%s1425_s1 + $0x38] sm:$0xff]   ;;  %v867_v32 = vcombine.low %v21_v31, %v21_v31  ;;  %v868_v33 = vcombine.high %v21_v31, %v21_v31  ;;  %v1103_v35 = vld [vmem:[%s1425_s1 + $0x140] sm:$0xff]  }
   0xb   :  { %955 = vmatpush3.bf16.msra.mxu0 %v1078_v9  ;;  %v1095_v26 = vld [vmem:[%s1425_s1 + $0xf0] sm:$0xff]   ;;  %v1099_v30 = vld [vmem:[%s1425_s1 + $0xf8] sm:$0xff]   ;;  %v22_v36 = vld [vmem:[%s1426_s0 + $0x8] sm:$0xff]  ;;  %v1150_v9 = vmov 0.0  }
   0xc   :  { %956 = vmatprep.subr.bf16.mxu0 %v1081_v12  ;;  %v1096_v27 = vld [vmem:[%s1425_s1 + $0xb0] sm:$0xff]   ;;  %v1102_v34 = vld [vmem:[%s1425_s1 + $0xb8] sm:$0xff]   ;;  %673 = vmatprep.mubr.bf16.mxu0 %v868_v33  ;;  %v869_v37 = vcombine.low %v22_v36, %v22_v36  ;;  %v870_v38 = vcombine.high %v22_v36, %v22_v36  ;;  %v1106_v39 = vld [vmem:[%s1425_s1 + $0x100] sm:$0xff]  }
   0xd   :  { %977 = vmatpush3.bf16.msra.mxu1 %v1080_v11  ;;  %v1107_v40 = vld [vmem:[%s1425_s1 + $0x1c0] sm:$0xff]   ;;  %v1109_v42 = vld [vmem:[%s1425_s1 + $0x148] sm:$0xff]   ;;  %v1113_v46 = vld [vmem:[%s1425_s1 + $0x150] sm:$0xff]  }
   0xe   :  { %978 = vmatprep.subr.bf16.mxu1 %v1083_v14  ;;  %713 = vmatprep.mubr.bf16.mxu1 %v870_v38  ;;  %v1108_v41 = vld [vmem:[%s1425_s1 + $0x180] sm:$0xff]   ;;  %v1110_v43 = vld [vmem:[%s1425_s1 + $0x108] sm:$0xff]   ;;  %v1114_v47 = vld [vmem:[%s1425_s1 + $0x110] sm:$0xff]  }
   0xf   :  { %957 = vmatpush3.bf16.msra.mxu0 %v1082_v13  ;;  %v1111_v44 = vld [vmem:[%s1425_s1 + $0x1c8] sm:$0xff]   ;;  %v1115_v48 = vld [vmem:[%s1425_s1 + $0x1d0] sm:$0xff]   ;;  %v1117_v50 = vld [vmem:[%s1425_s1 + $0x158] sm:$0xff]  }
  0x10   :  { %958 = vmatprep.subr.bf16.mxu0 %v1085_v16  ;;  %v1112_v45 = vld [vmem:[%s1425_s1 + $0x188] sm:$0xff]   ;;  %v1116_v49 = vld [vmem:[%s1425_s1 + $0x190] sm:$0xff]   ;;  %v1118_v51 = vld [vmem:[%s1425_s1 + $0x118] sm:$0xff]  }
  0x11   :  { %979 = vmatpush3.bf16.msra.mxu1 %v1084_v15  ;;  %v1119_v52 = vld [vmem:[%s1425_s1 + $0x1d8] sm:$0xff]   ;;  %v1121_v54 = vld [vmem:[%s1425_s1 + $0x160] sm:$0xff]   ;;  %v1125_v58 = vld [vmem:[%s1425_s1 + $0x168] sm:$0xff]  }
  0x12   :  { %980 = vmatprep.subr.bf16.mxu1 %v1087_v18  ;;  %v1120_v53 = vld [vmem:[%s1425_s1 + $0x198] sm:$0xff]   ;;  %v1122_v55 = vld [vmem:[%s1425_s1 + $0x120] sm:$0xff]   ;;  %v1126_v59 = vld [vmem:[%s1425_s1 + $0x128] sm:$0xff]  }
  0x13   :  { %959 = vmatpush3.bf16.msra.mxu0 %v1086_v17  ;;  %v1123_v56 = vld [vmem:[%s1425_s1 + $0x1e0] sm:$0xff]   ;;  %v1127_v60 = vld [vmem:[%s1425_s1 + $0x1e8] sm:$0xff]   ;;  %v1129_v62 = vld [vmem:[%s1425_s1 + $0x170] sm:$0xff]  }
  0x14   :  { %960 = vmatprep.subr.bf16.mxu0 %v1089_v20  ;;  %v1124_v57 = vld [vmem:[%s1425_s1 + $0x1a0] sm:$0xff]   ;;  %v1128_v61 = vld [vmem:[%s1425_s1 + $0x1a8] sm:$0xff]   ;;  %v1130_v63 = vld [vmem:[%s1425_s1 + $0x130] sm:$0xff]  }
  0x15   :  { %981 = vmatpush3.bf16.msra.mxu1 %v1088_v19  ;;  %v1131_v0 = vld [vmem:[%s1425_s1 + $0x1f0] sm:$0xff]   ;;  %v1133_v2 = vld [vmem:[%s1425_s1 + $0x178] sm:$0xff]   ;;  %v1141_v13 = vld [vmem:[%s1425_s1 + $0x200] sm:$0xff]  }
  0x16   :  { %982 = vmatprep.subr.bf16.mxu1 %v1091_v22  ;;  %v1132_v1 = vld [vmem:[%s1425_s1 + $0x1b0] sm:$0xff]   ;;  %v1134_v3 = vld [vmem:[%s1425_s1 + $0x138] sm:$0xff]   ;;  %v1142_v14 = vld [vmem:[%s1425_s1 + $0x208] sm:$0xff]  }
  0x17   :  { %961 = vmatpush3.bf16.msra.mxu0 %v1090_v21  ;;  %v1135_v4 = vld [vmem:[%s1425_s1 + $0x1f8] sm:$0xff]   ;;  %v23_v5 = vld [vmem:[%s1426_s0 + $0x10] sm:$0xff]  ;;  %v1145_v17 = vld [vmem:[%s1425_s1 + $0x220] sm:$0xff]  }
  0x18   :  { %962 = vmatprep.subr.bf16.mxu0 %v1093_v24  ;;  %v871_v6 = vcombine.low %v23_v5, %v23_v5  ;;  %v872_v7 = vcombine.high %v23_v5, %v23_v5  ;;  %v1138_v8 = vld [vmem:[%s1425_s1 + $0x1b8] sm:$0xff]   ;;  %v1143_v15 = vld [vmem:[%s1425_s1 + $0x210] sm:$0xff]   ;;  %v1146_v18 = vld [vmem:[%s1425_s1 + $0x228] sm:$0xff]  }
  0x19   :  { %983 = vmatpush3.bf16.msra.mxu1 %v1092_v23  ;;  %v24_v10 = vld [vmem:[%s1426_s0 + $0x18] sm:$0xff]  ;;  %v1147_v19 = vld [vmem:[%s1425_s1 + $0x230] sm:$0xff]   ;;  %v1149_v21 = vld [vmem:[%s1426_s0 + $0x20] ss:$0 sps:$4 sm:$0xff]  }
  0x1a   :  { %984 = vmatprep.subr.bf16.mxu1 %v1095_v26  ;;  %v873_v11 = vcombine.low %v24_v10, %v24_v10  ;;  %v874_v12 = vcombine.high %v24_v10, %v24_v10  ;;  %v1144_v16 = vld [vmem:[%s1425_s1 + $0x218] sm:$0xff]   ;;  %v866_v23 = vld [vmem:[%s1427_s2] ss:$0 sm:$0xff] }
  0x1b   :  { %963 = vmatpush3.bf16.msra.mxu0 %v1094_v25  ;;  %v1148_v20 = vld [vmem:[%s1425_s1 + $0x238] sm:$0xff]  }
  0x1c   :  { %964 = vmatprep.subr.bf16.mxu0 %v1097_v28 }
  0x1d   :  { %985 = vmatpush3.bf16.msra.mxu1 %v1096_v27 }
  0x1e   :  { %986 = vmatprep.subr.bf16.mxu1 %v1099_v30 }
  0x1f   :  { %965 = vmatpush3.bf16.msra.mxu0 %v1098_v29 }
  0x20   :  { %994 = vmatprep.subr.bf16.mxu0 %v1103_v35 }
  0x21   :  { %987 = vmatpush3.bf16.msra.mxu1 %v1102_v34 }
  0x22   :  { %674 = vmatmul.mubr.bf16.vlgmr.msra.gmra.mrb[0].mxu0 %v867_v32  ;;  %1016 = vmatprep.subr.bf16.mxu1 %v1107_v40 }
  0x23   :  { %995 = vmatpush3.bf16.msra.mxu0 %v1106_v39  ;;  %753 = vmatprep.mubr.bf16.mxu0 %v872_v7 }
  0x24   :  { %714 = vmatmul.mubr.bf16.vlgmr.msra.gmra.mrb[0].mxu1 %v869_v37  ;;  %996 = vmatprep.subr.bf16.mxu0 %v1109_v42 }
  0x25   :  { %1017 = vmatpush3.bf16.msra.mxu1 %v1108_v41  ;;  %793 = vmatprep.mubr.bf16.mxu1 %v874_v12 }
  0x26   :  { %1018 = vmatprep.subr.bf16.mxu1 %v1111_v44 }
  0x27   :  { %997 = vmatpush3.bf16.msra.mxu0 %v1110_v43 }
  0x28   :  { %998 = vmatprep.subr.bf16.mxu0 %v1113_v46 }
  0x29   :  { %1019 = vmatpush3.bf16.msra.mxu1 %v1112_v45 }
  0x2a   :  { %1020 = vmatprep.subr.bf16.mxu1 %v1115_v48 }
  0x2b   :  { %999 = vmatpush3.bf16.msra.mxu0 %v1114_v47 }
  0x2c   :  { %1000 = vmatprep.subr.bf16.mxu0 %v1117_v50 }
  0x2d   :  { %1021 = vmatpush3.bf16.msra.mxu1 %v1116_v49 }
  0x2e   :  { %1022 = vmatprep.subr.bf16.mxu1 %v1119_v52  ;;  %v948_v52 = vld [vmem:[%s1428_s3] ss:$0 sm:$0xff] }
  0x2f   :  { %1001 = vmatpush3.bf16.msra.mxu0 %v1118_v51 }
  0x30   :  { %1002 = vmatprep.subr.bf16.mxu0 %v1121_v54 }
  0x31   :  { %1023 = vmatpush3.bf16.msra.mxu1 %v1120_v53 }
  0x32   :  { %1024 = vmatprep.subr.bf16.mxu1 %v1123_v56 }
  0x33   :  { %1003 = vmatpush3.bf16.msra.mxu0 %v1122_v55  ;;  %v949_v55 = vld [vmem:[%s1429_s4] ss:$0 sm:$0xff] }
  0x34   :  { %1004 = vmatprep.subr.bf16.mxu0 %v1125_v58 }
  0x35   :  { %1025 = vmatpush3.bf16.msra.mxu1 %v1124_v57 }
  0x36   :  { %1026 = vmatprep.subr.bf16.mxu1 %v1127_v60 }
  0x37   :  { %1005 = vmatpush3.bf16.msra.mxu0 %v1126_v59 }
  0x38   :  { %1006 = vmatprep.subr.bf16.mxu0 %v1129_v62 }
  0x39   :  { %1027 = vmatpush3.bf16.msra.mxu1 %v1128_v61 }
  0x3a   :  { %1028 = vmatprep.subr.bf16.mxu1 %v1131_v0 }
  0x3b   :  { %1007 = vmatpush3.bf16.msra.mxu0 %v1130_v63 }
  0x3c   :  { %1008 = vmatprep.subr.bf16.mxu0 %v1133_v2 }
  0x3d   :  { %1029 = vmatpush3.bf16.msra.mxu1 %v1132_v1 }
  0x3e   :  { %1030 = vmatprep.subr.bf16.mxu1 %v1135_v4 }
  0x3f   :  { %1009 = vmatpush3.bf16.msra.mxu0 %v1134_v3 }
  0x40   :  { %1047 = vmatprep.subr.bf16.mxu0 %v1150_v9 }
  0x41   :  { %1031 = vmatpush3.bf16.msra.mxu1 %v1138_v8 }
  0x42   :  { %754 = vmatmul.mubr.bf16.vlgmr.msra.gmra.mrb[4].mxu0 %v871_v6 }
  0x43   :  { %1048 = vmatpush3.bf16.msra.mxu0 %v1141_v13  ;;  %1063 = vmatprep.mubr.msk.bf16.mxu0 %vm1151_vm0, %v1150_v9 }
  0x44   :  { %794 = vmatmul.mubr.bf16.vlgmr.msra.gmra.mrb[4].mxu1 %v873_v11  ;;  %1049 = vmatprep.subr.bf16.mxu0 %v1150_v9 }
  0x47   :  { %1050 = vmatpush3.bf16.msra.mxu0 %v1142_v14 }
  0x48   :  { %1051 = vmatprep.subr.bf16.mxu0 %v1150_v9 }
  0x4b   :  { %1052 = vmatpush3.bf16.msra.mxu0 %v1143_v15 }
  0x4c   :  { %1053 = vmatprep.subr.bf16.mxu0 %v1150_v9 }
  0x4f   :  { %1054 = vmatpush3.bf16.msra.mxu0 %v1144_v16 }
  0x50   :  { %1055 = vmatprep.subr.bf16.mxu0 %v1150_v9 }
  0x53   :  { %1056 = vmatpush3.bf16.msra.mxu0 %v1145_v17 }
  0x54   :  { %1057 = vmatprep.subr.bf16.mxu0 %v1150_v9 }
  0x57   :  { %1058 = vmatpush3.bf16.msra.mxu0 %v1146_v18 }
  0x58   :  { %1059 = vmatprep.subr.bf16.mxu0 %v1150_v9 }
  0x5b   :  { %1060 = vmatpush3.bf16.msra.mxu0 %v1147_v19 }
  0x5c   :  { %1061 = vmatprep.subr.bf16.mxu0 %v1150_v9 }
  0x5f   :  { %1062 = vmatpush3.bf16.msra.mxu0 %v1148_v20 }
  0x62   :  { %1064 = vmatmul.mubr.bf16.vlgmr.msra.gmra.mrb[8].mxu0 %v1149_v21 }
  0xf5   :  { %v966_v22 = vpop.f32.mrb[0].mxu0 }
  0xf6   :  { %v967_v24 = vpop.f32.mrb[1].mxu0 }
  0xf7   :  { %v968_v25 = vadd.f32 %v967_v24, %v966_v22  ;;  %v969_v26 = vpop.f32.mrb[2].mxu0  ;;  %v988_v27 = vpop.f32.mrb[0].mxu1 }
  0xf8   :  { %v970_v28 = vpop.f32.mrb[3].mxu0  ;;  %v989_v29 = vpop.f32.mrb[1].mxu1 }
  0xf9   :  { %v676_v30 = vadd.f32 %v968_v25, %v866_v23  ;;  %v990_v31 = vadd.f32 %v989_v29, %v988_v27  ;;  %v991_v32 = vpop.f32.mrb[2].mxu1 }
  0xfa   :  { %v992_v33 = vpop.f32.mrb[3].mxu1 }
  0xfb   :  { %v716_v34 = vadd.f32 %v990_v31, %v676_v30 }
 0x115   :  { %v1010_v35 = vpop.f32.mrb[4].mxu0 }
 0x116   :  { %v1011_v36 = vpop.f32.mrb[5].mxu0 }
 0x117   :  { %v1012_v37 = vadd.f32 %v1011_v36, %v1010_v35  ;;  %v1013_v38 = vpop.f32.mrb[6].mxu0  ;;  %v1032_v39 = vpop.f32.mrb[4].mxu1 }
 0x118   :  { %v1014_v40 = vpop.f32.mrb[7].mxu0  ;;  %v1033_v41 = vpop.f32.mrb[5].mxu1 }
 0x119   :  { %v756_v42 = vadd.f32 %v1012_v37, %v716_v34  ;;  %v1034_v43 = vadd.f32 %v1033_v41, %v1032_v39  ;;  %v1035_v44 = vpop.f32.mrb[6].mxu1 }
 0x11a   :  { %v1036_v45 = vpop.f32.mrb[7].mxu1 }
 0x11b   :  { %v796_v46 = vadd.f32 %v1034_v43, %v756_v42 }
 0x135   :  { %v835_v47 = vpop.f32.mrb[8].mxu0 }
 0x136   :  { %v836_v48 = vadd.f32 %v835_v47, %v796_v46  ;;  %v1065_v49 = vpop.f32.mrb[9].mxu0 }
 0x137   :  { %v838_v50 = vpop.f32.mrb[10].mxu0 }
 0x138   :  { %vm841_vm1 = vcmp.ge.f32.partialorder %v836_v48, 0.0  ;;  %v842_v51 = vmul.f32 0.2, %v836_v48  ;;  %v1066_v53 = vpop.f32.mrb[11].mxu0 }
 0x13a   :  { %v843_v54 = vsel %vm841_vm1, %v836_v48, %v842_v51 }
 0x13b   :  { %v851_v56 = vmul.f32 %v948_v52, %v843_v54 }
 0x13d   :  { %v859_v57 = vadd.f32 %v949_v55, %v851_v56 }
 0x13f   :  { %v860_v58 = vpack.c.bf16 %v859_v57, %v859_v57 }
 0x141   :  { %861 = vst [vmem:[%s1430_s5] sm:$0xf] %v860_v58 }

// kernel: discriminator_forward.7
= control target key start
LH: loop header
LB: loop body
LE: loop exit
PB: predicated region body
PF: predicated region fallthrough
CT: control target
= control target key end

     0   :  { %v1204_v21 = vmov 1966171168   ;;  %v188_v23 = vlaneseq  ;;  %vm1206_vm0 = vmmov 0   ;;  %vm915_vm2 = vcmask 1041408   ;;  %s1501_s1 = inlined_call_operand.vmem [shape: bf16[1152,128], index: 1, kind: input, shape index: {}]   ;;  %s1502_s0 = inlined_call_operand.vmem [shape: bf16[2,1152], index: 0, kind: input, shape index: {}]   ;;  %s1503_s6 = inlined_call_operand.<no memory space> [shape: f32[1,1], index: 6, kind: input, shape index: {}]   ;;  %s1504_s2 = inlined_call_operand.vmem [shape: f32[1,128], index: 2, kind: input, shape index: {}]   ;;  %s1505_s3 = inlined_call_operand.vmem [shape: f32[1,128], index: 3, kind: input, shape index: {}]   ;;  %s1506_s4 = inlined_call_operand.vmem [shape: f32[1,128], index: 4, kind: input, shape index: {}]   ;;  %s1507_s5 = inlined_call_operand.vmem [shape: f32[1,128], index: 5, kind: input, shape index: {}]   ;;  %s1508_s7 = inlined_call_operand.vmem [shape: f32[2,1], index: 7, kind: output, shape index: {}]  }
   0x1   :  { %v1131_v0 = vld [vmem:[%s1501_s1 + $0x40] sm:$0xff]   ;;  %v1135_v4 = vld [vmem:[%s1501_s1 + $0x48] sm:$0xff]   ;;  %v1139_v8 = vld [vmem:[%s1501_s1 + $0x50] sm:$0xff]   ;;  %v186_v22 = vunpack.c.l.s4 %v1204_v21  ;;  %vm927_vm3 = vcmask 1024  }
   0x2   :  { %v1132_v1 = vld [vmem:[%s1501_s1] sm:$0xff]   ;;  %1011 = vmatprep.subr.bf16.mxu0 %v1131_v0  ;;  %v1136_v5 = vld [vmem:[%s1501_s1 + $0x8] sm:$0xff]   ;;  %v1140_v9 = vld [vmem:[%s1501_s1 + $0x10] sm:$0xff]   ;;  %v189_v29 = vshrl.u32 %v188_v23, 7 }
   0x3   :  { %v1133_v2 = vld [vmem:[%s1501_s1 + $0xc0] sm:$0xff]   ;;  %1012 = vmatpush3.bf16.msra.mxu0 %v1132_v1  ;;  %v1137_v6 = vld [vmem:[%s1501_s1 + $0xc8] sm:$0xff]   ;;  %v1141_v10 = vld [vmem:[%s1501_s1 + $0xd0] sm:$0xff]   ;;  %v187_v28 = vunpack.c.0.s8 %v186_v22 }
   0x4   :  { %v1134_v3 = vld [vmem:[%s1501_s1 + $0x80] sm:$0xff]   ;;  %1033 = vmatprep.subr.bf16.mxu1 %v1133_v2  ;;  %1013 = vmatprep.subr.bf16.mxu0 %v1135_v4  ;;  %v1138_v7 = vld [vmem:[%s1501_s1 + $0x88] sm:$0xff]   ;;  %v1142_v11 = vld [vmem:[%s1501_s1 + $0x90] sm:$0xff]  }
   0x5   :  { %1034 = vmatpush3.bf16.msra.mxu1 %v1134_v3  ;;  %v1143_v12 = vld [vmem:[%s1501_s1 + $0x58] sm:$0xff]   ;;  %v1147_v16 = vld [vmem:[%s1501_s1 + $0x60] sm:$0xff]   ;;  %v1151_v20 = vld [vmem:[%s1501_s1 + $0x68] sm:$0xff]   ;;  %v1334_v34 = vsub.s32 %v187_v28, %v189_v29 }
   0x6   :  { %1035 = vmatprep.subr.bf16.mxu1 %v1137_v6  ;;  %v1144_v13 = vld [vmem:[%s1501_s1 + $0x18] sm:$0xff]   ;;  %v1148_v17 = vld [vmem:[%s1501_s1 + $0x20] sm:$0xff]   ;;  %v1152_v24 = vld [vmem:[%s1501_s1 + $0x28] sm:$0xff]  }
   0x7   :  { %1014 = vmatpush3.bf16.msra.mxu0 %v1136_v5  ;;  %v1145_v14 = vld [vmem:[%s1501_s1 + $0xd8] sm:$0xff]   ;;  %v1149_v18 = vld [vmem:[%s1501_s1 + $0xe0] sm:$0xff]   ;;  %v1153_v25 = vld [vmem:[%s1501_s1 + $0xe8] sm:$0xff]  }
   0x8   :  { %1015 = vmatprep.subr.bf16.mxu0 %v1139_v8  ;;  %v1146_v15 = vld [vmem:[%s1501_s1 + $0x98] sm:$0xff]   ;;  %v1150_v19 = vld [vmem:[%s1501_s1 + $0xa0] sm:$0xff]   ;;  %v1154_v26 = vld [vmem:[%s1501_s1 + $0xa8] sm:$0xff]  }
   0x9   :  { %1036 = vmatpush3.bf16.msra.mxu1 %v1138_v7  ;;  %v1155_v27 = vld [vmem:[%s1501_s1 + $0x70] sm:$0xff]   ;;  %v1159_v33 = vld [vmem:[%s1501_s1 + $0x78] sm:$0xff]   ;;  %v29_v37 = vld [vmem:[%s1502_s0] sm:$0xff] }
   0xa   :  { %1037 = vmatprep.subr.bf16.mxu1 %v1141_v10  ;;  %v1156_v30 = vld [vmem:[%s1501_s1 + $0x30] sm:$0xff]   ;;  %v1160_v35 = vld [vmem:[%s1501_s1 + $0x38] sm:$0xff]   ;;  %v184_v38 = vcombine.high %v29_v37, %v29_v37  ;;  %v191_v39 = vrot.slane %v29_v37, %v1334_v34  ;;  %v1164_v41 = vld [vmem:[%s1501_s1 + $0x140] sm:$0xff]  }
   0xb   :  { %1016 = vmatpush3.bf16.msra.mxu0 %v1140_v9  ;;  %v1157_v31 = vld [vmem:[%s1501_s1 + $0xf0] sm:$0xff]   ;;  %v1161_v36 = vld [vmem:[%s1501_s1 + $0xf8] sm:$0xff]   ;;  %v1166_v45 = vld [vmem:[%s1501_s1 + $0x1c0] sm:$0xff]  }
   0xc   :  { %1017 = vmatprep.subr.bf16.mxu0 %v1143_v12  ;;  %v1158_v32 = vld [vmem:[%s1501_s1 + $0xb0] sm:$0xff]   ;;  %v1163_v40 = vld [vmem:[%s1501_s1 + $0xb8] sm:$0xff]   ;;  %v199_v42 = vcombine.high %v191_v39, %v191_v39  ;;  %v207_v43 = vrot.slane %v191_v39, %v1334_v34  ;;  %v1354_v44 = vrot.slane %v184_v38, %v1334_v34  ;;  %v1165_v47 = vld [vmem:[%s1501_s1 + $0x100] sm:$0xff]  }
   0xd   :  { %1038 = vmatpush3.bf16.msra.mxu1 %v1142_v11  ;;  %v1168_v50 = vld [vmem:[%s1501_s1 + $0x148] sm:$0xff]   ;;  %v1167_v52 = vld [vmem:[%s1501_s1 + $0x180] sm:$0xff]   ;;  %v1172_v57 = vld [vmem:[%s1501_s1 + $0x150] sm:$0xff]  }
   0xe   :  { %1039 = vmatprep.subr.bf16.mxu1 %v1145_v14  ;;  %v221_v46 = vrot.slane %v199_v42, %v1334_v34  ;;  %v200_v48 = vcombine.high %v1354_v44, %v1354_v44  ;;  %v229_v49 = vcombine.high %v207_v43, %v207_v43  ;;  %v1170_v54 = vld [vmem:[%s1501_s1 + $0x1c8] sm:$0xff]   ;;  %v1174_v59 = vld [vmem:[%s1501_s1 + $0x1d0] sm:$0xff]   ;;  %v1176_v61 = vld [vmem:[%s1501_s1 + $0x158] sm:$0xff]  }
   0xf   :  { %1018 = vmatpush3.bf16.msra.mxu0 %v1144_v13  ;;  %v1169_v55 = vld [vmem:[%s1501_s1 + $0x108] sm:$0xff]   ;;  %v1173_v60 = vld [vmem:[%s1501_s1 + $0x110] sm:$0xff]   ;;  %v1178_v63 = vld [vmem:[%s1501_s1 + $0x1d8] sm:$0xff]  }
  0x10   :  { %1019 = vmatprep.subr.bf16.mxu0 %v1147_v16  ;;  %720 = vmatprep.mubr.bf16.mxu0 %v221_v46  ;;  %v231_v51 = vcombine.high %v221_v46, %v221_v46  ;;  %v228_v53 = vrot.slane %v200_v48, %v1334_v34  ;;  %v1171_v58 = vld [vmem:[%s1501_s1 + $0x188] sm:$0xff]   ;;  %v1175_v62 = vld [vmem:[%s1501_s1 + $0x190] sm:$0xff]   ;;  %v1177_v0 = vld [vmem:[%s1501_s1 + $0x118] sm:$0xff]  }
  0x11   :  { %1040 = vmatpush3.bf16.msra.mxu1 %v1146_v15  ;;  %v1180_v1 = vld [vmem:[%s1501_s1 + $0x160] sm:$0xff]   ;;  %v1179_v2 = vld [vmem:[%s1501_s1 + $0x198] sm:$0xff]   ;;  %v1184_v5 = vld [vmem:[%s1501_s1 + $0x168] sm:$0xff]  }
  0x12   :  { %1041 = vmatprep.subr.bf16.mxu1 %v1149_v18  ;;  %760 = vmatprep.mubr.bf16.mxu1 %v231_v51  ;;  %v232_v56 = vcombine.high %v228_v53, %v228_v53  ;;  %v1182_v3 = vld [vmem:[%s1501_s1 + $0x1e0] sm:$0xff]   ;;  %v1186_v7 = vld [vmem:[%s1501_s1 + $0x1e8] sm:$0xff]   ;;  %v1188_v9 = vld [vmem:[%s1501_s1 + $0x170] sm:$0xff]  }
  0x13   :  { %1020 = vmatpush3.bf16.msra.mxu0 %v1148_v17  ;;  %v1181_v4 = vld [vmem:[%s1501_s1 + $0x120] sm:$0xff]   ;;  %v1185_v8 = vld [vmem:[%s1501_s1 + $0x128] sm:$0xff]   ;;  %v1190_v11 = vld [vmem:[%s1501_s1 + $0x1f0] sm:$0xff]   ;;  %v214_v17 = vrot.slane %v1354_v44, %v1334_v34 }
  0x14   :  { %1021 = vmatprep.subr.bf16.mxu0 %v1151_v20  ;;  %v1183_v6 = vld [vmem:[%s1501_s1 + $0x1a0] sm:$0xff]   ;;  %v1187_v10 = vld [vmem:[%s1501_s1 + $0x1a8] sm:$0xff]   ;;  %v1189_v12 = vld [vmem:[%s1501_s1 + $0x130] sm:$0xff]   ;;  %v1205_v20 = vmov 0.0  }
  0x15   :  { %1042 = vmatpush3.bf16.msra.mxu1 %v1150_v19  ;;  %v1192_v13 = vld [vmem:[%s1501_s1 + $0x178] sm:$0xff]   ;;  %v1191_v14 = vld [vmem:[%s1501_s1 + $0x1b0] sm:$0xff]   ;;  %v1196_v19 = vld [vmem:[%s1501_s1 + $0x200] sm:$0xff]   ;;  %v230_v21 = vcombine.high %v214_v17, %v214_v17 }
  0x16   :  { %1043 = vmatprep.subr.bf16.mxu1 %v1153_v25  ;;  %v1194_v15 = vld [vmem:[%s1501_s1 + $0x1f8] sm:$0xff]   ;;  %v1197_v22 = vld [vmem:[%s1501_s1 + $0x208] sm:$0xff]   ;;  %v1198_v25 = vld [vmem:[%s1501_s1 + $0x210] sm:$0xff]  }
  0x17   :  { %1022 = vmatpush3.bf16.msra.mxu0 %v1152_v24  ;;  %v1193_v16 = vld [vmem:[%s1501_s1 + $0x138] sm:$0xff]   ;;  %v934_v23 = vld.sshfl [vmem:[%s1502_s0 + $0x8] sm:$0x1 pattern:$0x75316420]  ;;  %v1202_v29 = vld [vmem:[%s1501_s1 + $0x230] sm:$0xff]  }
  0x18   :  { %1023 = vmatprep.subr.bf16.mxu0 %v1155_v27  ;;  %v1195_v18 = vld [vmem:[%s1501_s1 + $0x1b8] sm:$0xff]   ;;  %v246_v24 = vrot.slane %v934_v23, %v1334_v34  ;;  %v1200_v27 = vld [vmem:[%s1501_s1 + $0x220] sm:$0xff]   ;;  %v1201_v28 = vld [vmem:[%s1501_s1 + $0x228] sm:$0xff]  }
  0x19   :  { %1044 = vmatpush3.bf16.msra.mxu1 %v1154_v26  ;;  %v1199_v26 = vld [vmem:[%s1501_s1 + $0x218] sm:$0xff]  }
  0x1a   :  { %1045 = vmatprep.subr.bf16.mxu1 %v1157_v31  ;;  %v12_v31 = vstv %s1503_s6 }
  0x1b   :  { %1024 = vmatpush3.bf16.msra.mxu0 %v1156_v30  ;;  %v1203_v30 = vld [vmem:[%s1501_s1 + $0x238] sm:$0xff]   ;;  %13 = vst [vmem:[#allocation2] sm:$0x1] %v12_v31 }
  0x1c   :  { %1025 = vmatprep.subr.bf16.mxu0 %v1159_v33  ;;  %v933_v33 = vld [vmem:[%s1504_s2] ss:$0 sm:$0xff] }
  0x1d   :  { %1046 = vmatpush3.bf16.msra.mxu1 %v1158_v32 }
  0x1e   :  { %1047 = vmatprep.subr.bf16.mxu1 %v1161_v36 }
  0x1f   :  { %1026 = vmatpush3.bf16.msra.mxu0 %v1160_v35 }
  0x20   :  { %1055 = vmatprep.subr.bf16.mxu0 %v1164_v41 }
  0x21   :  { %1048 = vmatpush3.bf16.msra.mxu1 %v1163_v40 }
  0x22   :  { %1077 = vmatprep.subr.bf16.mxu1 %v1166_v45  ;;  %721 = vmatmul.mubr.bf16.vlgmr.msra.gmra.mrb[0].mxu0 %v207_v43 }
  0x23   :  { %1056 = vmatpush3.bf16.msra.mxu0 %v1165_v47  ;;  %800 = vmatprep.mubr.bf16.mxu0 %v228_v53 }
  0x24   :  { %761 = vmatmul.mubr.bf16.vlgmr.msra.gmra.mrb[0].mxu1 %v229_v49  ;;  %1057 = vmatprep.subr.bf16.mxu0 %v1168_v50 }
  0x25   :  { %1078 = vmatpush3.bf16.msra.mxu1 %v1167_v52  ;;  %840 = vmatprep.mubr.bf16.mxu1 %v232_v56 }
  0x26   :  { %1079 = vmatprep.subr.bf16.mxu1 %v1170_v54 }
  0x27   :  { %1058 = vmatpush3.bf16.msra.mxu0 %v1169_v55 }
  0x28   :  { %1059 = vmatprep.subr.bf16.mxu0 %v1172_v57 }
  0x29   :  { %1080 = vmatpush3.bf16.msra.mxu1 %v1171_v58 }
  0x2a   :  { %1081 = vmatprep.subr.bf16.mxu1 %v1174_v59 }
  0x2b   :  { %1060 = vmatpush3.bf16.msra.mxu0 %v1173_v60 }
  0x2c   :  { %1061 = vmatprep.subr.bf16.mxu0 %v1176_v61 }
  0x2d   :  { %1082 = vmatpush3.bf16.msra.mxu1 %v1175_v62 }
  0x2e   :  { %1083 = vmatprep.subr.bf16.mxu1 %v1178_v63  ;;  %v1007_v63 = vld [vmem:[%s1505_s3] ss:$0 sm:$0xff] }
  0x2f   :  { %1062 = vmatpush3.bf16.msra.mxu0 %v1177_v0 }
  0x30   :  { %1063 = vmatprep.subr.bf16.mxu0 %v1180_v1  ;;  %v1008_v1 = vld [vmem:[%s1506_s4] ss:$0 sm:$0xff] }
  0x31   :  { %1084 = vmatpush3.bf16.msra.mxu1 %v1179_v2 }
  0x32   :  { %1085 = vmatprep.subr.bf16.mxu1 %v1182_v3  ;;  %v1009_v3 = vld [vmem:[%s1507_s5] ss:$0 sm:$0xff] }
  0x33   :  { %1064 = vmatpush3.bf16.msra.mxu0 %v1181_v4 }
  0x34   :  { %1065 = vmatprep.subr.bf16.mxu0 %v1184_v5 }
  0x35   :  { %1086 = vmatpush3.bf16.msra.mxu1 %v1183_v6 }
  0x36   :  { %1087 = vmatprep.subr.bf16.mxu1 %v1186_v7  ;;  %v1010_v7 = vld [vmem:[#allocation2] ss:$0 sm:$0xff] }
  0x37   :  { %1066 = vmatpush3.bf16.msra.mxu0 %v1185_v8 }
  0x38   :  { %1067 = vmatprep.subr.bf16.mxu0 %v1188_v9 }
  0x39   :  { %1088 = vmatpush3.bf16.msra.mxu1 %v1187_v10 }
  0x3a   :  { %1089 = vmatprep.subr.bf16.mxu1 %v1190_v11 }
  0x3b   :  { %1068 = vmatpush3.bf16.msra.mxu0 %v1189_v12 }
  0x3c   :  { %1069 = vmatprep.subr.bf16.mxu0 %v1192_v13 }
  0x3d   :  { %1090 = vmatpush3.bf16.msra.mxu1 %v1191_v14 }
  0x3e   :  { %1091 = vmatprep.subr.bf16.mxu1 %v1194_v15 }
  0x3f   :  { %1070 = vmatpush3.bf16.msra.mxu0 %v1193_v16 }
  0x40   :  { %1108 = vmatprep.subr.bf16.mxu0 %v1205_v20 }
  0x41   :  { %1092 = vmatpush3.bf16.msra.mxu1 %v1195_v18 }
  0x42   :  { %801 = vmatmul.mubr.bf16.vlgmr.msra.gmra.mrb[4].mxu0 %v214_v17 }
  0x43   :  { %1109 = vmatpush3.bf16.msra.mxu0 %v1196_v19  ;;  %1124 = vmatprep.mubr.msk.bf16.mxu0 %vm1206_vm0, %v1205_v20 }
  0x44   :  { %841 = vmatmul.mubr.bf16.vlgmr.msra.gmra.mrb[4].mxu1 %v230_v21  ;;  %1110 = vmatprep.subr.bf16.mxu0 %v1205_v20 }
  0x47   :  { %1111 = vmatpush3.bf16.msra.mxu0 %v1197_v22 }
  0x48   :  { %1112 = vmatprep.subr.bf16.mxu0 %v1205_v20 }
  0x4b   :  { %1113 = vmatpush3.bf16.msra.mxu0 %v1198_v25 }
  0x4c   :  { %1114 = vmatprep.subr.bf16.mxu0 %v1205_v20 }
  0x4f   :  { %1115 = vmatpush3.bf16.msra.mxu0 %v1199_v26 }
  0x50   :  { %1116 = vmatprep.subr.bf16.mxu0 %v1205_v20 }
  0x53   :  { %1117 = vmatpush3.bf16.msra.mxu0 %v1200_v27 }
  0x54   :  { %1118 = vmatprep.subr.bf16.mxu0 %v1205_v20 }
  0x57   :  { %1119 = vmatpush3.bf16.msra.mxu0 %v1201_v28 }
  0x58   :  { %1120 = vmatprep.subr.bf16.mxu0 %v1205_v20 }
  0x5b   :  { %1121 = vmatpush3.bf16.msra.mxu0 %v1202_v29 }
  0x5c   :  { %1122 = vmatprep.subr.bf16.mxu0 %v1205_v20 }
  0x5f   :  { %1123 = vmatpush3.bf16.msra.mxu0 %v1203_v30 }
  0x62   :  { %1125 = vmatmul.mubr.bf16.vlgmr.msra.gmra.mrb[8].mxu0 %v246_v24 }
  0xf5   :  { %v1027_v32 = vpop.f32.mrb[0].mxu0 }
  0xf6   :  { %v1028_v34 = vpop.f32.mrb[1].mxu0 }
  0xf7   :  { %v1029_v35 = vadd.f32 %v1028_v34, %v1027_v32  ;;  %v1030_v36 = vpop.f32.mrb[2].mxu0  ;;  %v1049_v37 = vpop.f32.mrb[0].mxu1 }
  0xf8   :  { %v1031_v38 = vpop.f32.mrb[3].mxu0  ;;  %v1050_v39 = vpop.f32.mrb[1].mxu1 }
  0xf9   :  { %v723_v40 = vadd.f32 %v1029_v35, %v933_v33  ;;  %v1051_v41 = vadd.f32 %v1050_v39, %v1049_v37  ;;  %v1052_v42 = vpop.f32.mrb[2].mxu1 }
  0xfa   :  { %v1053_v43 = vpop.f32.mrb[3].mxu1 }
  0xfb   :  { %v763_v44 = vadd.f32 %v1051_v41, %v723_v40 }
 0x115   :  { %v1071_v45 = vpop.f32.mrb[4].mxu0 }
 0x116   :  { %v1072_v46 = vpop.f32.mrb[5].mxu0 }
 0x117   :  { %v1073_v47 = vadd.f32 %v1072_v46, %v1071_v45  ;;  %v1074_v48 = vpop.f32.mrb[6].mxu0  ;;  %v1093_v49 = vpop.f32.mrb[4].mxu1 }
 0x118   :  { %v1075_v50 = vpop.f32.mrb[7].mxu0  ;;  %v1094_v51 = vpop.f32.mrb[5].mxu1 }
 0x119   :  { %v803_v52 = vadd.f32 %v1073_v47, %v763_v44  ;;  %v1095_v53 = vadd.f32 %v1094_v51, %v1093_v49  ;;  %v1096_v54 = vpop.f32.mrb[6].mxu1 }
 0x11a   :  { %v1097_v55 = vpop.f32.mrb[7].mxu1 }
 0x11b   :  { %v843_v56 = vadd.f32 %v1095_v53, %v803_v52 }
 0x135   :  { %v882_v57 = vpop.f32.mrb[8].mxu0 }
 0x136   :  { %v883_v58 = vadd.f32 %v882_v57, %v843_v56  ;;  %v1126_v59 = vpop.f32.mrb[9].mxu0 }
 0x137   :  { %v885_v60 = vpop.f32.mrb[10].mxu0 }
 0x138   :  { %vm888_vm1 = vcmp.ge.f32.partialorder %v883_v58, 0.0  ;;  %v889_v61 = vmul.f32 0.2, %v883_v58  ;;  %v1127_v62 = vpop.f32.mrb[11].mxu0 }
 0x13a   :  { %v890_v0 = vsel %vm888_vm1, %v883_v58, %v889_v61 }
 0x13b   :  { %v898_v2 = vmul.f32 %v1007_v63, %v890_v0 }
 0x13d   :  { %v906_v4 = vadd.f32 %v1008_v1, %v898_v2 }
 0x13f   :  { %v914_v5 = vmul.f32 %v1009_v3, %v906_v4 }
 0x141   :  { %v916_v6 = vsel %vm915_vm2, %v914_v5, 0.0 }
 0x142   :  { %917 = vadd.xlane.f32.xlu0 %v916_v6 }
 0x1cf   :  { %v918_v8 = vpop.xlane.xlu0 %917 }
 0x1d0   :  { %v926_v9 = vadd.f32 %v1010_v7, %v918_v8 }
 0x1d2   :  { %928 = vst.msk [vmem:[%s1508_s7] sm:$0x3] %vm927_vm3, %v926_v9 }

</bundles_post_ra>
